<compile_context>
chip_gen: v7x
topology: tpu7x:2x2x1
jax: 0.10.0
libtpu: 0.0.40
codegen_flags: <defaults>
</compile_context>

<pallas_src>
import math
import functools

import jax
import jax.numpy as jnp
from jax.experimental import pallas as pl
from jax.experimental.pallas import tpu as pltpu


def _round_up(x, m):
    return (x + m - 1) // m * m


# ---------------------------------------------------------------------------
# Pallas kernel 1: tiled matmul + bias (+ optional ReLU), f32 accumulation
# ---------------------------------------------------------------------------
def _matmul_bias_act_kernel(x_ref, w_ref, b_ref, o_ref, acc_ref, *, relu):
    @pl.when(pl.program_id(2) == 0)
    def _():
        acc_ref[...] = jnp.zeros_like(acc_ref)

    acc_ref[...] += jnp.dot(x_ref[...], w_ref[...],
                            preferred_element_type=jnp.float32)

    @pl.when(pl.program_id(2) == pl.num_programs(2) - 1)
    def _():
        out = acc_ref[...] + b_ref[...]          # bias added once, at finalize
        if relu:
            out = jnp.maximum(out, 0.0)
        o_ref[...] = out.astype(o_ref.dtype)


def matmul_bias_act(x, w, b, *, relu, tm=256, tn=256, tk=2048):
    """[M,K] @ [K,N] + b[N] (optional ReLU) -> [M,N] f32, bf16 MXU operands."""
    M, K = x.shape
    K2, N = w.shape
    assert K == K2, (K, K2)

    TM = min(tm, _round_up(M, 8))
    TN = min(tn, _round_up(N, 128))
    TK = min(tk, _round_up(K, 128))
    Mp, Np, Kp = _round_up(M, TM), _round_up(N, TN), _round_up(K, TK)

    xp = jnp.pad(x.astype(jnp.float32), ((0, Mp - M), (0, Kp - K))).astype(jnp.bfloat16)
    wp = jnp.pad(w.astype(jnp.float32), ((0, Kp - K), (0, Np - N))).astype(jnp.bfloat16)
    bp = jnp.pad(b.astype(jnp.float32), (0, Np - N)).reshape(1, Np)

    grid = (Mp // TM, Np // TN, Kp // TK)
    cost = pl.CostEstimate(
        flops=2 * Mp * Np * Kp,
        transcendentals=0,
        bytes_accessed=Mp * Kp * 2 + Kp * Np * 2 + Np * 4 + Mp * Np * 4,
    )

    out = pl.pallas_call(
        functools.partial(_matmul_bias_act_kernel, relu=relu),
        out_shape=jax.ShapeDtypeStruct((Mp, Np), jnp.float32),
        grid_spec=pltpu.PrefetchScalarGridSpec(
            num_scalar_prefetch=0,
            grid=grid,
            in_specs=[
                pl.BlockSpec((TM, TK), lambda i, j, k: (i, k)),
                pl.BlockSpec((TK, TN), lambda i, j, k: (k, j)),
                pl.BlockSpec((1, TN), lambda i, j, k: (0, j)),
            ],
            out_specs=pl.BlockSpec((TM, TN), lambda i, j, k: (i, j)),
            scratch_shapes=[pltpu.VMEM((TM, TN), jnp.float32)],
        ),
        compiler_params=pltpu.CompilerParams(
            dimension_semantics=("parallel", "parallel", "arbitrary"),
            vmem_limit_bytes=32 * 1024 * 1024,
        ),
        cost_estimate=cost,
    )(xp, wp, bp)
    return out[:M, :N]


# ---------------------------------------------------------------------------
# Pallas kernel 2: fused network tail  x -> ReLU(x@W1+b1) -> (.)@W2+b2
# (W2/b2 are the concatenated policy+value heads)
# ---------------------------------------------------------------------------
def _mlp_tail_kernel(x_ref, w1_ref, b1_ref, w2_ref, b2_ref, o_ref):
    latent = jnp.dot(x_ref[...], w1_ref[...], preferred_element_type=jnp.float32)
    latent = jnp.maximum(latent + b1_ref[...], 0.0)
    out = jnp.dot(latent.astype(w2_ref.dtype), w2_ref[...],
                  preferred_element_type=jnp.float32)
    o_ref[...] = (out + b2_ref[...]).astype(o_ref.dtype)


def mlp_tail(x, w1, b1, w2, b2, *, tm=256):
    """Fused Linear+ReLU -> Linear: [M,K1] -> [M,H] -> [M,N2] in one kernel."""
    M, K1 = x.shape
    _, H = w1.shape
    _, N2 = w2.shape

    TM = min(tm, _round_up(M, 8))
    K1p, Hp, N2p = _round_up(K1, 128), _round_up(H, 128), _round_up(N2, 128)
    Mp = _round_up(M, TM)

    xp = jnp.pad(x.astype(jnp.float32), ((0, Mp - M), (0, K1p - K1))).astype(jnp.bfloat16)
    w1p = jnp.pad(w1.astype(jnp.float32), ((0, K1p - K1), (0, Hp - H))).astype(jnp.bfloat16)
    b1p = jnp.pad(b1.astype(jnp.float32), (0, Hp - H)).reshape(1, Hp)
    w2p = jnp.pad(w2.astype(jnp.float32), ((0, Hp - H), (0, N2p - N2))).astype(jnp.bfloat16)
    b2p = jnp.pad(b2.astype(jnp.float32), (0, N2p - N2)).reshape(1, N2p)

    out = pl.pallas_call(
        _mlp_tail_kernel,
        out_shape=jax.ShapeDtypeStruct((Mp, N2p), jnp.float32),
        grid_spec=pltpu.PrefetchScalarGridSpec(
            num_scalar_prefetch=0,
            grid=(Mp // TM,),
            in_specs=[
                pl.BlockSpec((TM, K1p), lambda i: (i, 0)),
                pl.BlockSpec((K1p, Hp), lambda i: (0, 0)),
                pl.BlockSpec((1, Hp), lambda i: (0, 0)),
                pl.BlockSpec((Hp, N2p), lambda i: (0, 0)),
                pl.BlockSpec((1, N2p), lambda i: (0, 0)),
            ],
            out_specs=pl.BlockSpec((TM, N2p), lambda i: (i, 0)),
        ),
        compiler_params=pltpu.CompilerParams(
            dimension_semantics=("parallel",),
            vmem_limit_bytes=32 * 1024 * 1024,
        ),
    )(xp, w1p, b1p, w2p, b2p)
    return out[:M, :N2]


# ---------------------------------------------------------------------------
# Conv2d (valid padding, square kernel) = NHWC im2col (XLA glue) + Pallas matmul
# ---------------------------------------------------------------------------
def conv2d_relu_nhwc(x, w, b, stride):
    """x: [B, H, W, C] NHWC; w: torch layout [OC, IC, k, k]; b: [OC]."""
    B, H, W, C = x.shape
    OC, IC, k, _ = w.shape
    assert IC == C
    OH = (H - k) // stride + 1
    OW = (W - k) // stride + 1

    h_idx = (jnp.arange(OH) * stride)[:, None] + jnp.arange(k)[None, :]   # [OH, k]
    w_idx = (jnp.arange(OW) * stride)[:, None] + jnp.arange(k)[None, :]   # [OW, k]
    # advanced indexing -> [B, OH, OW, k, k, C]; feature order (kh, kw, c)
    patches = x[:, h_idx[:, None, :, None], w_idx[None, :, None, :], :]
    patches = patches.reshape(B * OH * OW, k * k * C)

    # torch weight [OC, IC, kh, kw] -> [kh, kw, IC, OC] -> [K, OC] (matches patch order)
    w_mat = jnp.transpose(w, (2, 3, 1, 0)).reshape(k * k * IC, OC)
    out = matmul_bias_act(patches, w_mat, b, relu=True)                    # [B*OH*OW, OC]
    return out.reshape(B, OH, OW, OC)                                      # stay NHWC


# ---------------------------------------------------------------------------
# Parameter init (deterministic, orthogonal like the torch module)
# ---------------------------------------------------------------------------
def init_params(key, in_shape, policy_dim):
    c, h, w = in_shape
    cnn_out_dim = 64 * ((h - 28) // 8) * ((w - 28) // 8)
    ks = jax.random.split(key, 6)

    def ortho(k_, shape, gain):
        return jax.nn.initializers.orthogonal(gain)(k_, shape, jnp.float32)

    g = math.sqrt(2.0)
    return {
        "conv1_w": ortho(ks[0], (32, c, 8, 8), g),  "conv1_b": jnp.zeros((32,), jnp.float32),
        "conv2_w": ortho(ks[1], (64, 32, 4, 4), g), "conv2_b": jnp.zeros((64,), jnp.float32),
        "conv3_w": ortho(ks[2], (64, 64, 3, 3), g), "conv3_b": jnp.zeros((64,), jnp.float32),
        # Linear weights stored as [in, out] (torch stores [out, in], applies x @ W.T)
        "fc_w": ortho(ks[3], (cnn_out_dim, 512), g),       "fc_b": jnp.zeros((512,), jnp.float32),
        "policy_w": ortho(ks[4], (512, policy_dim), 0.01), "policy_b": jnp.zeros((policy_dim,), jnp.float32),
        "value_w": ortho(ks[5], (512, 1), 1.0),            "value_b": jnp.zeros((1,), jnp.float32),
    }


# ---------------------------------------------------------------------------
# Forward pass (mirrors CNN.forward); wrapper accepts NCHW like PyTorch
# ---------------------------------------------------------------------------
def cnn_forward(params, x):
    xh = jnp.transpose(x, (0, 2, 3, 1))                                    # NCHW -> NHWC once
    h = conv2d_relu_nhwc(xh, params["conv1_w"], params["conv1_b"], stride=4)
    h = conv2d_relu_nhwc(h, params["conv2_w"], params["conv2_b"], stride=2)
    h = conv2d_relu_nhwc(h, params["conv3_w"], params["conv3_b"], stride=1)
    B = h.shape[0]
    # torch Flatten operates on NCHW: transpose back once, then flatten.
    flat = jnp.transpose(h, (0, 3, 1, 2)).reshape(B, -1)

    # Fuse policy + value heads into one [512, P+1] matmul; fuse with the fc layer.
    head_w = jnp.concatenate([params["policy_w"], params["value_w"]], axis=1)
    head_b = jnp.concatenate([params["policy_b"], params["value_b"]], axis=0)
    heads = mlp_tail(flat, params["fc_w"], params["fc_b"], head_w, head_b)  # [B, P+1]

    P = params["policy_w"].shape[1]
    return heads[:, :P], heads[:, P:P + 1]


if __name__ == "__main__":
    key = jax.random.PRNGKey(0)
    pkey, xkey = jax.random.split(key)

    # Small shapes consistent with the module's arithmetic:
    # H=W=44 -> conv stack output 64 x 2 x 2 -> cnn_out_dim = 64*((44-28)//8)**2 = 256
    batch = 2
    in_shape = (4, 44, 44)
    policy_dim = 6

    params = init_params(pkey, in_shape, policy_dim)
    x = jax.random.normal(xkey, (batch,) + in_shape, dtype=jnp.float32)

    policy, value = jax.jit(cnn_forward)(params, x)
    jax.block_until_ready((policy, value))

    assert policy.shape == (batch, policy_dim), policy.shape
    assert value.shape == (batch, 1), value.shape
    assert policy.dtype == jnp.float32 and value.dtype == jnp.float32
    assert bool(jnp.all(jnp.isfinite(policy))) and bool(jnp.all(jnp.isfinite(value)))
    print("KERNEL_OK")
</pallas_src>

<mosaic_0001>
module attributes {stable_mosaic.version = 11 : i64} {
  func.func @_matmul_bias_act_kernel(%arg0: i32, %arg1: i32, %arg2: i32, %arg3: memref<200x256xbf16, #tpu.memory_space<vmem>>, %arg4: memref<256x128xbf16, #tpu.memory_space<vmem>>, %arg5: memref<1x128xf32, #tpu.memory_space<vmem>>, %arg6: memref<200x128xf32, #tpu.memory_space<vmem>>, %arg7: memref<200x128xf32, #tpu.memory_space<vmem>>) attributes {dimension_semantics = [#tpu.dimension_semantics<parallel>, #tpu.dimension_semantics<parallel>, #tpu.dimension_semantics<arbitrary>], iteration_bounds = array<i64: 1, 1, 1>, scalar_prefetch = 0 : i64, scratch_operands = 1 : i64, tpu.core_type = #tpu.core_type<tc>, window_params = [{transform_indices = @transform_0, window_bounds = array<i64: 200, 256>}, {transform_indices = @transform_1, window_bounds = array<i64: 256, 128>}, {transform_indices = @transform_2, window_bounds = array<i64: 1, 128>}, {transform_indices = @transform_3, window_bounds = array<i64: 200, 128>}]} {
    %c0_i32 = arith.constant 0 : i32
    %0 = arith.cmpi eq, %arg2, %c0_i32 : i32
    %1 = arith.extui %0 : i1 to i32
    %c0_i32_0 = arith.constant 0 : i32
    %2 = arith.cmpi ne, %1, %c0_i32_0 : i32
    scf.if %2 {
      %cst_10 = arith.constant 0.000000e+00 : f32
      %12 = vector.broadcast %cst_10 : f32 to vector<200x128xf32>
      %c0_11 = arith.constant 0 : index
      %c0_12 = arith.constant 0 : index
      %13 = vector.load %arg7[%c0_11, %c0_12] : memref<200x128xf32, #tpu.memory_space<vmem>>, vector<200x128xf32>
      tpu.vector_store %arg7[%c0_11, %c0_12], %12 {strides = array<i32>} : memref<200x128xf32, #tpu.memory_space<vmem>>, vector<200x128xf32>,
    } else {
    }
    %c0 = arith.constant 0 : index
    %c0_1 = arith.constant 0 : index
    %3 = vector.load %arg7[%c0, %c0_1] : memref<200x128xf32, #tpu.memory_space<vmem>>, vector<200x128xf32>
    %c0_2 = arith.constant 0 : index
    %c0_3 = arith.constant 0 : index
    %4 = vector.load %arg3[%c0_2, %c0_3] : memref<200x256xbf16, #tpu.memory_space<vmem>>, vector<200x256xbf16>
    %c0_4 = arith.constant 0 : index
    %c0_5 = arith.constant 0 : index
    %5 = vector.load %arg4[%c0_4, %c0_5] : memref<256x128xbf16, #tpu.memory_space<vmem>>, vector<256x128xbf16>
    %cst = arith.constant dense<0.000000e+00> : vector<200x128xf32>
    %6 = tpu.matmul %4, %5, %cst {dimension_numbers = #tpu.dot_dimension_numbers<[1], [0], [0], [1], [0, 0, 1, 1], [], []>} : vector<200x256xbf16>, vector<256x128xbf16>, vector<200x128xf32> -> vector<200x128xf32>
    %7 = arith.addf %3, %6 : vector<200x128xf32>
    %c0_6 = arith.constant 0 : index
    %c0_7 = arith.constant 0 : index
    %8 = vector.load %arg7[%c0_6, %c0_7] : memref<200x128xf32, #tpu.memory_space<vmem>>, vector<200x128xf32>
    tpu.vector_store %arg7[%c0_6, %c0_7], %7 {strides = array<i32>} : memref<200x128xf32, #tpu.memory_space<vmem>>, vector<200x128xf32>,
    %c0_i32_8 = arith.constant 0 : i32
    %9 = arith.cmpi eq, %arg2, %c0_i32_8 : i32
    %10 = arith.extui %9 : i1 to i32
    %c0_i32_9 = arith.constant 0 : i32
    %11 = arith.cmpi ne, %10, %c0_i32_9 : i32
    scf.if %11 {
      %c0_10 = arith.constant 0 : index
      %c0_11 = arith.constant 0 : index
      %12 = vector.load %arg7[%c0_10, %c0_11] : memref<200x128xf32, #tpu.memory_space<vmem>>, vector<200x128xf32>
      %c0_12 = arith.constant 0 : index
      %c0_13 = arith.constant 0 : index
      %13 = vector.load %arg5[%c0_12, %c0_13] : memref<1x128xf32, #tpu.memory_space<vmem>>, vector<1x128xf32>
      %14 = vector.broadcast %13 : vector<1x128xf32> to vector<200x128xf32>
      %15 = arith.addf %12, %14 : vector<200x128xf32>
      %cst_14 = arith.constant 0.000000e+00 : f32
      %16 = vector.broadcast %cst_14 : f32 to vector<200x128xf32>
      %17 = arith.maximumf %15, %16 : vector<200x128xf32>
      %c0_15 = arith.constant 0 : index
      %c0_16 = arith.constant 0 : index
      %18 = vector.load %arg6[%c0_15, %c0_16] : memref<200x128xf32, #tpu.memory_space<vmem>>, vector<200x128xf32>
      tpu.vector_store %arg6[%c0_15, %c0_16], %17 {strides = array<i32>} : memref<200x128xf32, #tpu.memory_space<vmem>>, vector<200x128xf32>,
    } else {
    }
    return
  }
  func.func @transform_0(%arg0: i32, %arg1: i32, %arg2: i32) -> (i32, i32) {
    %c0_i32 = arith.constant 0 : i32
    return %arg0, %arg2 : i32, i32
  }
  func.func @transform_1(%arg0: i32, %arg1: i32, %arg2: i32) -> (i32, i32) {
    %c0_i32 = arith.constant 0 : i32
    return %arg2, %arg1 : i32, i32
  }
  func.func @transform_2(%arg0: i32, %arg1: i32, %arg2: i32) -> (i32, i32) {
    %c0_i32 = arith.constant 0 : i32
    %c0_i32_0 = arith.constant 0 : i32
    return %c0_i32, %arg1 : i32, i32
  }
  func.func @transform_3(%arg0: i32, %arg1: i32, %arg2: i32) -> (i32, i32) {
    %c0_i32 = arith.constant 0 : i32
    return %arg0, %arg1 : i32, i32
  }
}

module attributes {stable_mosaic.version = 11 : i64} {
  func.func @_matmul_bias_act_kernel(%arg0: i32, %arg1: i32, %arg2: i32, %arg3: memref<32x512xbf16, #tpu.memory_space<vmem>>, %arg4: memref<512x128xbf16, #tpu.memory_space<vmem>>, %arg5: memref<1x128xf32, #tpu.memory_space<vmem>>, %arg6: memref<32x128xf32, #tpu.memory_space<vmem>>, %arg7: memref<32x128xf32, #tpu.memory_space<vmem>>) attributes {dimension_semantics = [#tpu.dimension_semantics<parallel>, #tpu.dimension_semantics<parallel>, #tpu.dimension_semantics<arbitrary>], iteration_bounds = array<i64: 1, 1, 1>, scalar_prefetch = 0 : i64, scratch_operands = 1 : i64, tpu.core_type = #tpu.core_type<tc>, window_params = [{transform_indices = @transform_0, window_bounds = array<i64: 32, 512>}, {transform_indices = @transform_1, window_bounds = array<i64: 512, 128>}, {transform_indices = @transform_2, window_bounds = array<i64: 1, 128>}, {transform_indices = @transform_3, window_bounds = array<i64: 32, 128>}]} {
    %c0_i32 = arith.constant 0 : i32
    %0 = arith.cmpi eq, %arg2, %c0_i32 : i32
    %1 = arith.extui %0 : i1 to i32
    %c0_i32_0 = arith.constant 0 : i32
    %2 = arith.cmpi ne, %1, %c0_i32_0 : i32
    scf.if %2 {
      %cst_10 = arith.constant 0.000000e+00 : f32
      %12 = vector.broadcast %cst_10 : f32 to vector<32x128xf32>
      %c0_11 = arith.constant 0 : index
      %c0_12 = arith.constant 0 : index
      %13 = vector.load %arg7[%c0_11, %c0_12] : memref<32x128xf32, #tpu.memory_space<vmem>>, vector<32x128xf32>
      tpu.vector_store %arg7[%c0_11, %c0_12], %12 {strides = array<i32>} : memref<32x128xf32, #tpu.memory_space<vmem>>, vector<32x128xf32>,
    } else {
    }
    %c0 = arith.constant 0 : index
    %c0_1 = arith.constant 0 : index
    %3 = vector.load %arg7[%c0, %c0_1] : memref<32x128xf32, #tpu.memory_space<vmem>>, vector<32x128xf32>
    %c0_2 = arith.constant 0 : index
    %c0_3 = arith.constant 0 : index
    %4 = vector.load %arg3[%c0_2, %c0_3] : memref<32x512xbf16, #tpu.memory_space<vmem>>, vector<32x512xbf16>
    %c0_4 = arith.constant 0 : index
    %c0_5 = arith.constant 0 : index
    %5 = vector.load %arg4[%c0_4, %c0_5] : memref<512x128xbf16, #tpu.memory_space<vmem>>, vector<512x128xbf16>
    %cst = arith.constant dense<0.000000e+00> : vector<32x128xf32>
    %6 = tpu.matmul %4, %5, %cst {dimension_numbers = #tpu.dot_dimension_numbers<[1], [0], [0], [1], [0, 0, 1, 1], [], []>} : vector<32x512xbf16>, vector<512x128xbf16>, vector<32x128xf32> -> vector<32x128xf32>
    %7 = arith.addf %3, %6 : vector<32x128xf32>
    %c0_6 = arith.constant 0 : index
    %c0_7 = arith.constant 0 : index
    %8 = vector.load %arg7[%c0_6, %c0_7] : memref<32x128xf32, #tpu.memory_space<vmem>>, vector<32x128xf32>
    tpu.vector_store %arg7[%c0_6, %c0_7], %7 {strides = array<i32>} : memref<32x128xf32, #tpu.memory_space<vmem>>, vector<32x128xf32>,
    %c0_i32_8 = arith.constant 0 : i32
    %9 = arith.cmpi eq, %arg2, %c0_i32_8 : i32
    %10 = arith.extui %9 : i1 to i32
    %c0_i32_9 = arith.constant 0 : i32
    %11 = arith.cmpi ne, %10, %c0_i32_9 : i32
    scf.if %11 {
      %c0_10 = arith.constant 0 : index
      %c0_11 = arith.constant 0 : index
      %12 = vector.load %arg7[%c0_10, %c0_11] : memref<32x128xf32, #tpu.memory_space<vmem>>, vector<32x128xf32>
      %c0_12 = arith.constant 0 : index
      %c0_13 = arith.constant 0 : index
      %13 = vector.load %arg5[%c0_12, %c0_13] : memref<1x128xf32, #tpu.memory_space<vmem>>, vector<1x128xf32>
      %14 = vector.broadcast %13 : vector<1x128xf32> to vector<32x128xf32>
      %15 = arith.addf %12, %14 : vector<32x128xf32>
      %cst_14 = arith.constant 0.000000e+00 : f32
      %16 = vector.broadcast %cst_14 : f32 to vector<32x128xf32>
      %17 = arith.maximumf %15, %16 : vector<32x128xf32>
      %c0_15 = arith.constant 0 : index
      %c0_16 = arith.constant 0 : index
      %18 = vector.load %arg6[%c0_15, %c0_16] : memref<32x128xf32, #tpu.memory_space<vmem>>, vector<32x128xf32>
      tpu.vector_store %arg6[%c0_15, %c0_16], %17 {strides = array<i32>} : memref<32x128xf32, #tpu.memory_space<vmem>>, vector<32x128xf32>,
    } else {
    }
    return
  }
  func.func @transform_0(%arg0: i32, %arg1: i32, %arg2: i32) -> (i32, i32) {
    %c0_i32 = arith.constant 0 : i32
    return %arg0, %arg2 : i32, i32
  }
  func.func @transform_1(%arg0: i32, %arg1: i32, %arg2: i32) -> (i32, i32) {
    %c0_i32 = arith.constant 0 : i32
    return %arg2, %arg1 : i32, i32
  }
  func.func @transform_2(%arg0: i32, %arg1: i32, %arg2: i32) -> (i32, i32) {
    %c0_i32 = arith.constant 0 : i32
    %c0_i32_0 = arith.constant 0 : i32
    return %c0_i32, %arg1 : i32, i32
  }
  func.func @transform_3(%arg0: i32, %arg1: i32, %arg2: i32) -> (i32, i32) {
    %c0_i32 = arith.constant 0 : i32
    return %arg0, %arg1 : i32, i32
  }
}

module attributes {stable_mosaic.version = 11 : i64} {
  func.func @_matmul_bias_act_kernel(%arg0: i32, %arg1: i32, %arg2: i32, %arg3: memref<8x640xbf16, #tpu.memory_space<vmem>>, %arg4: memref<640x128xbf16, #tpu.memory_space<vmem>>, %arg5: memref<1x128xf32, #tpu.memory_space<vmem>>, %arg6: memref<8x128xf32, #tpu.memory_space<vmem>>, %arg7: memref<8x128xf32, #tpu.memory_space<vmem>>) attributes {dimension_semantics = [#tpu.dimension_semantics<parallel>, #tpu.dimension_semantics<parallel>, #tpu.dimension_semantics<arbitrary>], iteration_bounds = array<i64: 1, 1, 1>, scalar_prefetch = 0 : i64, scratch_operands = 1 : i64, tpu.core_type = #tpu.core_type<tc>, window_params = [{transform_indices = @transform_0, window_bounds = array<i64: 8, 640>}, {transform_indices = @transform_1, window_bounds = array<i64: 640, 128>}, {transform_indices = @transform_2, window_bounds = array<i64: 1, 128>}, {transform_indices = @transform_3, window_bounds = array<i64: 8, 128>}]} {
    %c0_i32 = arith.constant 0 : i32
    %0 = arith.cmpi eq, %arg2, %c0_i32 : i32
    %1 = arith.extui %0 : i1 to i32
    %c0_i32_0 = arith.constant 0 : i32
    %2 = arith.cmpi ne, %1, %c0_i32_0 : i32
    scf.if %2 {
      %cst_10 = arith.constant 0.000000e+00 : f32
      %12 = vector.broadcast %cst_10 : f32 to vector<8x128xf32>
      %c0_11 = arith.constant 0 : index
      %c0_12 = arith.constant 0 : index
      %13 = vector.load %arg7[%c0_11, %c0_12] : memref<8x128xf32, #tpu.memory_space<vmem>>, vector<8x128xf32>
      tpu.vector_store %arg7[%c0_11, %c0_12], %12 {strides = array<i32>} : memref<8x128xf32, #tpu.memory_space<vmem>>, vector<8x128xf32>,
    } else {
    }
    %c0 = arith.constant 0 : index
    %c0_1 = arith.constant 0 : index
    %3 = vector.load %arg7[%c0, %c0_1] : memref<8x128xf32, #tpu.memory_space<vmem>>, vector<8x128xf32>
    %c0_2 = arith.constant 0 : index
    %c0_3 = arith.constant 0 : index
    %4 = vector.load %arg3[%c0_2, %c0_3] : memref<8x640xbf16, #tpu.memory_space<vmem>>, vector<8x640xbf16>
    %c0_4 = arith.constant 0 : index
    %c0_5 = arith.constant 0 : index
    %5 = vector.load %arg4[%c0_4, %c0_5] : memref<640x128xbf16, #tpu.memory_space<vmem>>, vector<640x128xbf16>
    %cst = arith.constant dense<0.000000e+00> : vector<8x128xf32>
    %6 = tpu.matmul %4, %5, %cst {dimension_numbers = #tpu.dot_dimension_numbers<[1], [0], [0], [1], [0, 0, 1, 1], [], []>} : vector<8x640xbf16>, vector<640x128xbf16>, vector<8x128xf32> -> vector<8x128xf32>
    %7 = arith.addf %3, %6 : vector<8x128xf32>
    %c0_6 = arith.constant 0 : index
    %c0_7 = arith.constant 0 : index
    %8 = vector.load %arg7[%c0_6, %c0_7] : memref<8x128xf32, #tpu.memory_space<vmem>>, vector<8x128xf32>
    tpu.vector_store %arg7[%c0_6, %c0_7], %7 {strides = array<i32>} : memref<8x128xf32, #tpu.memory_space<vmem>>, vector<8x128xf32>,
    %c0_i32_8 = arith.constant 0 : i32
    %9 = arith.cmpi eq, %arg2, %c0_i32_8 : i32
    %10 = arith.extui %9 : i1 to i32
    %c0_i32_9 = arith.constant 0 : i32
    %11 = arith.cmpi ne, %10, %c0_i32_9 : i32
    scf.if %11 {
      %c0_10 = arith.constant 0 : index
      %c0_11 = arith.constant 0 : index
      %12 = vector.load %arg7[%c0_10, %c0_11] : memref<8x128xf32, #tpu.memory_space<vmem>>, vector<8x128xf32>
      %c0_12 = arith.constant 0 : index
      %c0_13 = arith.constant 0 : index
      %13 = vector.load %arg5[%c0_12, %c0_13] : memref<1x128xf32, #tpu.memory_space<vmem>>, vector<1x128xf32>
      %14 = vector.broadcast %13 : vector<1x128xf32> to vector<8x128xf32>
      %15 = arith.addf %12, %14 : vector<8x128xf32>
      %cst_14 = arith.constant 0.000000e+00 : f32
      %16 = vector.broadcast %cst_14 : f32 to vector<8x128xf32>
      %17 = arith.maximumf %15, %16 : vector<8x128xf32>
      %c0_15 = arith.constant 0 : index
      %c0_16 = arith.constant 0 : index
      %18 = vector.load %arg6[%c0_15, %c0_16] : memref<8x128xf32, #tpu.memory_space<vmem>>, vector<8x128xf32>
      tpu.vector_store %arg6[%c0_15, %c0_16], %17 {strides = array<i32>} : memref<8x128xf32, #tpu.memory_space<vmem>>, vector<8x128xf32>,
    } else {
    }
    return
  }
  func.func @transform_0(%arg0: i32, %arg1: i32, %arg2: i32) -> (i32, i32) {
    %c0_i32 = arith.constant 0 : i32
    return %arg0, %arg2 : i32, i32
  }
  func.func @transform_1(%arg0: i32, %arg1: i32, %arg2: i32) -> (i32, i32) {
    %c0_i32 = arith.constant 0 : i32
    return %arg2, %arg1 : i32, i32
  }
  func.func @transform_2(%arg0: i32, %arg1: i32, %arg2: i32) -> (i32, i32) {
    %c0_i32 = arith.constant 0 : i32
    %c0_i32_0 = arith.constant 0 : i32
    return %c0_i32, %arg1 : i32, i32
  }
  func.func @transform_3(%arg0: i32, %arg1: i32, %arg2: i32) -> (i32, i32) {
    %c0_i32 = arith.constant 0 : i32
    return %arg0, %arg1 : i32, i32
  }
}

module attributes {stable_mosaic.version = 11 : i64} {
  func.func @_mlp_tail_kernel(%arg0: i32, %arg1: memref<8x256xbf16, #tpu.memory_space<vmem>>, %arg2: memref<256x512xbf16, #tpu.memory_space<vmem>>, %arg3: memref<1x512xf32, #tpu.memory_space<vmem>>, %arg4: memref<512x128xbf16, #tpu.memory_space<vmem>>, %arg5: memref<1x128xf32, #tpu.memory_space<vmem>>, %arg6: memref<8x128xf32, #tpu.memory_space<vmem>>) attributes {dimension_semantics = [#tpu.dimension_semantics<parallel>], iteration_bounds = array<i64: 1>, scalar_prefetch = 0 : i64, scratch_operands = 0 : i64, tpu.core_type = #tpu.core_type<tc>, window_params = [{transform_indices = @transform_0, window_bounds = array<i64: 8, 256>}, {pipeline_mode = #tpu.pipeline_mode<synchronous>, transform_indices = @transform_1, window_bounds = array<i64: 256, 512>}, {pipeline_mode = #tpu.pipeline_mode<synchronous>, transform_indices = @transform_2, window_bounds = array<i64: 1, 512>}, {pipeline_mode = #tpu.pipeline_mode<synchronous>, transform_indices = @transform_3, window_bounds = array<i64: 512, 128>}, {pipeline_mode = #tpu.pipeline_mode<synchronous>, transform_indices = @transform_4, window_bounds = array<i64: 1, 128>}, {transform_indices = @transform_5, window_bounds = array<i64: 8, 128>}]} {
    %c0 = arith.constant 0 : index
    %c0_0 = arith.constant 0 : index
    %0 = vector.load %arg1[%c0, %c0_0] : memref<8x256xbf16, #tpu.memory_space<vmem>>, vector<8x256xbf16>
    %c0_1 = arith.constant 0 : index
    %c0_2 = arith.constant 0 : index
    %1 = vector.load %arg2[%c0_1, %c0_2] : memref<256x512xbf16, #tpu.memory_space<vmem>>, vector<256x512xbf16>
    %cst = arith.constant dense<0.000000e+00> : vector<8x512xf32>
    %2 = tpu.matmul %0, %1, %cst {dimension_numbers = #tpu.dot_dimension_numbers<[1], [0], [0], [1], [0, 0, 1, 1], [], []>} : vector<8x256xbf16>, vector<256x512xbf16>, vector<8x512xf32> -> vector<8x512xf32>
    %c0_3 = arith.constant 0 : index
    %c0_4 = arith.constant 0 : index
    %3 = vector.load %arg3[%c0_3, %c0_4] : memref<1x512xf32, #tpu.memory_space<vmem>>, vector<1x512xf32>
    %4 = vector.broadcast %3 : vector<1x512xf32> to vector<8x512xf32>
    %5 = arith.addf %2, %4 : vector<8x512xf32>
    %cst_5 = arith.constant 0.000000e+00 : f32
    %6 = vector.broadcast %cst_5 : f32 to vector<8x512xf32>
    %7 = arith.maximumf %5, %6 : vector<8x512xf32>
    %8 = arith.truncf %7 : vector<8x512xf32> to vector<8x512xbf16>
    %c0_6 = arith.constant 0 : index
    %c0_7 = arith.constant 0 : index
    %9 = vector.load %arg4[%c0_6, %c0_7] : memref<512x128xbf16, #tpu.memory_space<vmem>>, vector<512x128xbf16>
    %cst_8 = arith.constant dense<0.000000e+00> : vector<8x128xf32>
    %10 = tpu.matmul %8, %9, %cst_8 {dimension_numbers = #tpu.dot_dimension_numbers<[1], [0], [0], [1], [0, 0, 1, 1], [], []>} : vector<8x512xbf16>, vector<512x128xbf16>, vector<8x128xf32> -> vector<8x128xf32>
    %c0_9 = arith.constant 0 : index
    %c0_10 = arith.constant 0 : index
    %11 = vector.load %arg5[%c0_9, %c0_10] : memref<1x128xf32, #tpu.memory_space<vmem>>, vector<1x128xf32>
    %12 = vector.broadcast %11 : vector<1x128xf32> to vector<8x128xf32>
    %13 = arith.addf %10, %12 : vector<8x128xf32>
    %c0_11 = arith.constant 0 : index
    %c0_12 = arith.constant 0 : index
    %14 = vector.load %arg6[%c0_11, %c0_12] : memref<8x128xf32, #tpu.memory_space<vmem>>, vector<8x128xf32>
    tpu.vector_store %arg6[%c0_11, %c0_12], %13 {strides = array<i32>} : memref<8x128xf32, #tpu.memory_space<vmem>>, vector<8x128xf32>,
    return
  }
  func.func @transform_0(%arg0: i32) -> (i32, i32) {
    %c0_i32 = arith.constant 0 : i32
    %c0_i32_0 = arith.constant 0 : i32
    return %arg0, %c0_i32 : i32, i32
  }
  func.func @transform_1(%arg0: i32) -> (i32, i32) {
    %c0_i32 = arith.constant 0 : i32
    %c0_i32_0 = arith.constant 0 : i32
    %c0_i32_1 = arith.constant 0 : i32
    return %c0_i32, %c0_i32_0 : i32, i32
  }
  func.func @transform_2(%arg0: i32) -> (i32, i32) {
    %c0_i32 = arith.constant 0 : i32
    %c0_i32_0 = arith.constant 0 : i32
    %c0_i32_1 = arith.constant 0 : i32
    return %c0_i32, %c0_i32_0 : i32, i32
  }
  func.func @transform_3(%arg0: i32) -> (i32, i32) {
    %c0_i32 = arith.constant 0 : i32
    %c0_i32_0 = arith.constant 0 : i32
    %c0_i32_1 = arith.constant 0 : i32
    return %c0_i32, %c0_i32_0 : i32, i32
  }
  func.func @transform_4(%arg0: i32) -> (i32, i32) {
    %c0_i32 = arith.constant 0 : i32
    %c0_i32_0 = arith.constant 0 : i32
    %c0_i32_1 = arith.constant 0 : i32
    return %c0_i32, %c0_i32_0 : i32, i32
  }
  func.func @transform_5(%arg0: i32) -> (i32, i32) {
    %c0_i32 = arith.constant 0 : i32
    %c0_i32_0 = arith.constant 0 : i32
    return %arg0, %c0_i32 : i32, i32
  }
}

</mosaic_0001>

<bundles_post_ra>
// kernel: cnn_forward.4
= control target key start
LH: loop header
LB: loop body
LE: loop exit
PB: predicated region body
PF: predicated region fallthrough
CT: control target
= control target key end

     0   :  { %s1104_s1 = inlined_call_operand.vmem [shape: bf16[256,128], index: 1, kind: input, shape index: {}]   ;;  %s1105_s0 = inlined_call_operand.vmem [shape: bf16[200,256], index: 0, kind: input, shape index: {}]   ;;  %s1106_s2 = inlined_call_operand.vmem [shape: f32[1,128], index: 2, kind: input, shape index: {}]   ;;  %s1107_s3 = inlined_call_operand.vmem [shape: f32[200,128], index: 3, kind: output, shape index: {}]  }
   0x1   :  { %v802_v0 = vld [vmem:[%s1104_s1 + $0x40] sm:$0xff]   ;;  %v804_v2 = vld [vmem:[%s1104_s1 + $0x48] sm:$0xff]   ;;  %v806_v4 = vld [vmem:[%s1104_s1 + $0x50] sm:$0xff]  }
   0x2   :  { %v803_v1 = vld [vmem:[%s1104_s1] sm:$0xff]   ;;  %692 = vmatprep.subr.bf16.mxu0 %v802_v0  ;;  %786 = vmatprep.subr.bf16.mxu1 %v802_v0  ;;  %v805_v3 = vld [vmem:[%s1104_s1 + $0x8] sm:$0xff]   ;;  %v807_v5 = vld [vmem:[%s1104_s1 + $0x10] sm:$0xff]  }
   0x3   :  { %693 = vmatpush3.bf16.msra.mxu0 %v803_v1  ;;  %794 = vmatpush3.bf16.msra.mxu1 %v803_v1  ;;  %v808_v6 = vld [vmem:[%s1104_s1 + $0x58] sm:$0xff]   ;;  %v810_v8 = vld [vmem:[%s1104_s1 + $0x60] sm:$0xff]   ;;  %v812_v10 = vld [vmem:[%s1104_s1 + $0x68] sm:$0xff]  }
   0x4   :  { %694 = vmatprep.subr.bf16.mxu0 %v804_v2  ;;  %787 = vmatprep.subr.bf16.mxu1 %v804_v2  ;;  %v809_v7 = vld [vmem:[%s1104_s1 + $0x18] sm:$0xff]   ;;  %v811_v9 = vld [vmem:[%s1104_s1 + $0x20] sm:$0xff]   ;;  %v813_v13 = vld [vmem:[%s1104_s1 + $0x28] sm:$0xff]  }
   0x5   :  { %v820_v11 = vld [vmem:[%s1105_s0 + $0x4] ss:$8 sps:$4 sm:$0xff]   ;;  %v823_v12 = vld [vmem:[%s1105_s0 + $0x74] ss:$8 sps:$4 sm:$0xff]   ;;  %v818_v18 = vld [vmem:[%s1105_s0] ss:$8 sps:$4 sm:$0xff]  }
   0x6   :  { %v814_v14 = vld [vmem:[%s1104_s1 + $0x70] sm:$0xff]   ;;  %381 = vmatprep.mubr.bf16.mxu0 %v820_v11  ;;  %437 = vmatprep.mubr.bf16.mxu1 %v823_v12  ;;  %v816_v16 = vld [vmem:[%s1104_s1 + $0x78] sm:$0xff]   ;;  %v827_v21 = vld [vmem:[%s1105_s0 + $0x84] ss:$8 sps:$4 sm:$0xff]  }
   0x7   :  { %695 = vmatpush3.bf16.msra.mxu0 %v805_v3  ;;  %795 = vmatpush3.bf16.msra.mxu1 %v805_v3  ;;  %v815_v15 = vld [vmem:[%s1104_s1 + $0x30] sm:$0xff]   ;;  %v817_v17 = vld [vmem:[%s1104_s1 + $0x38] sm:$0xff]   ;;  %v831_v23 = vld [vmem:[%s1105_s0 + $0x80] ss:$8 sps:$4 sm:$0xff]  }
   0x8   :  { %696 = vmatprep.subr.bf16.mxu0 %v806_v4  ;;  %788 = vmatprep.subr.bf16.mxu1 %v806_v4  ;;  %v821_v19 = vld [vmem:[%s1105_s0 + $0x70] ss:$8 sps:$4 sm:$0xff]   ;;  %v824_v20 = vld [vmem:[%s1105_s0 + $0x14] ss:$8 sps:$4 sm:$0xff]   ;;  %v829_v24 = vld [vmem:[%s1105_s0 + $0x24] ss:$8 sps:$4 sm:$0xff]  }
   0x9   :  { %v826_v22 = vld [vmem:[%s1105_s0 + $0x10] ss:$8 sps:$4 sm:$0xff]   ;;  %v833_v25 = vld [vmem:[%s1105_s0 + $0x94] ss:$8 sps:$4 sm:$0xff]   ;;  %v832_v26 = vld [vmem:[%s1105_s0 + $0x20] ss:$8 sps:$4 sm:$0xff]  }
   0xa   :  { %v837_v27 = vld [vmem:[%s1105_s0 + $0x90] ss:$8 sps:$4 sm:$0xff]   ;;  %v835_v28 = vld [vmem:[%s1105_s0 + $0x34] ss:$8 sps:$4 sm:$0xff]   ;;  %v839_v29 = vld [vmem:[%s1105_s0 + $0xa4] ss:$8 sps:$4 sm:$0xff]  }
   0xb   :  { %697 = vmatpush3.bf16.msra.mxu0 %v807_v5  ;;  %796 = vmatpush3.bf16.msra.mxu1 %v807_v5  ;;  %v838_v30 = vld [vmem:[%s1105_s0 + $0x30] ss:$8 sps:$4 sm:$0xff]   ;;  %v843_v31 = vld [vmem:[%s1105_s0 + $0xa0] ss:$8 sps:$4 sm:$0xff]   ;;  %v841_v32 = vld [vmem:[%s1105_s0 + $0x44] ss:$8 sps:$4 sm:$0xff]  }
   0xc   :  { %698 = vmatprep.subr.bf16.mxu0 %v808_v6  ;;  %789 = vmatprep.subr.bf16.mxu1 %v808_v6  ;;  %v845_v33 = vld [vmem:[%s1105_s0 + $0xb4] ss:$8 sps:$4 sm:$0xff]   ;;  %v93_v34 = vld [vmem:[%s1105_s0 + $0xc0] sm:$0xff]  ;;  %v849_v36 = vld [vmem:[%s1105_s0 + $0xb0] ss:$8 sps:$4 sm:$0xff]  }
   0xd   :  { %v844_v35 = vld [vmem:[%s1105_s0 + $0x40] ss:$8 sps:$4 sm:$0xff]   ;;  %v847_v37 = vld [vmem:[%s1105_s0 + $0x54] ss:$8 sps:$4 sm:$0xff]   ;;  %v674_v38 = vcombine.high %v93_v34, %v93_v34  ;;  %v850_v39 = vld [vmem:[%s1105_s0 + $0x50] ss:$8 sps:$4 sm:$0xff]   ;;  %v673_v40 = vcombine.low %v93_v34, %v93_v34 }
   0xe   :  { %v852_v41 = vld [vmem:[%s1105_s0 + $0x64] ss:$8 sps:$4 sm:$0xff]   ;;  %v855_v42 = vld [vmem:[%s1105_s0 + $0x60] ss:$8 sps:$4 sm:$0xff]  }
   0xf   :  { %699 = vmatpush3.bf16.msra.mxu0 %v809_v7  ;;  %797 = vmatpush3.bf16.msra.mxu1 %v809_v7  ;;  %v1002_v46 = vld [vmem:[%s1106_s2] ss:$0 sm:$0xff] }
  0x10   :  { %700 = vmatprep.subr.bf16.mxu0 %v810_v8  ;;  %790 = vmatprep.subr.bf16.mxu1 %v810_v8 }
  0x13   :  { %701 = vmatpush3.bf16.msra.mxu0 %v811_v9  ;;  %798 = vmatpush3.bf16.msra.mxu1 %v811_v9 }
  0x14   :  { %702 = vmatprep.subr.bf16.mxu0 %v812_v10  ;;  %791 = vmatprep.subr.bf16.mxu1 %v812_v10 }
  0x17   :  { %703 = vmatpush3.bf16.msra.mxu0 %v813_v13  ;;  %799 = vmatpush3.bf16.msra.mxu1 %v813_v13 }
  0x18   :  { %704 = vmatprep.subr.bf16.mxu0 %v814_v14  ;;  %792 = vmatprep.subr.bf16.mxu1 %v814_v14 }
  0x1b   :  { %705 = vmatpush3.bf16.msra.mxu0 %v815_v15  ;;  %800 = vmatpush3.bf16.msra.mxu1 %v815_v15 }
  0x1c   :  { %706 = vmatprep.subr.bf16.mxu0 %v816_v16  ;;  %793 = vmatprep.subr.bf16.mxu1 %v816_v16 }
  0x1f   :  { %707 = vmatpush3.bf16.msra.mxu0 %v817_v17  ;;  %801 = vmatpush3.bf16.msra.mxu1 %v817_v17 }
  0x22   :  { %382 = vmatmul.mubr.bf16.vlgmr.msra.gmra.mrb[0].mxu0 %v818_v18  ;;  %438 = vmatmul.mubr.bf16.vlgmr.msra.gmra.mrb[0].mxu1 %v821_v19 }
  0x23   :  { %389 = vmatprep.mubr.bf16.mxu0 %v824_v20  ;;  %445 = vmatprep.mubr.bf16.mxu1 %v827_v21 }
  0x2a   :  { %390 = vmatmul.mubr.bf16.gmra.mrb[4].mxu0 %v826_v22  ;;  %446 = vmatmul.mubr.bf16.gmra.mrb[4].mxu1 %v831_v23 }
  0x2b   :  { %397 = vmatprep.mubr.bf16.mxu0 %v829_v24  ;;  %453 = vmatprep.mubr.bf16.mxu1 %v833_v25 }
  0x32   :  { %398 = vmatmul.mubr.bf16.gmra.mrb[8].mxu0 %v832_v26  ;;  %454 = vmatmul.mubr.bf16.gmra.mrb[8].mxu1 %v837_v27 }
  0x33   :  { %405 = vmatprep.mubr.bf16.mxu0 %v835_v28  ;;  %461 = vmatprep.mubr.bf16.mxu1 %v839_v29 }
  0x3a   :  { %406 = vmatmul.mubr.bf16.gmra.mrb[12].mxu0 %v838_v30  ;;  %462 = vmatmul.mubr.bf16.gmra.mrb[12].mxu1 %v843_v31 }
  0x3b   :  { %413 = vmatprep.mubr.bf16.mxu0 %v841_v32  ;;  %469 = vmatprep.mubr.bf16.mxu1 %v845_v33 }
  0x42   :  { %414 = vmatmul.mubr.bf16.gmra.mrb[16].mxu0 %v844_v35  ;;  %470 = vmatmul.mubr.bf16.gmra.mrb[16].mxu1 %v849_v36 }
  0x43   :  { %421 = vmatprep.mubr.bf16.mxu0 %v847_v37  ;;  %477 = vmatprep.mubr.bf16.mxu1 %v674_v38 }
  0x4a   :  { %422 = vmatmul.mubr.bf16.gmra.mrb[20].mxu0 %v850_v39  ;;  %478 = vmatmul.mubr.bf16.gmra.mrb[20].mxu1 %v673_v40 }
  0x4b   :  { %429 = vmatprep.mubr.bf16.mxu0 %v852_v41 }
  0x52   :  { %430 = vmatmul.mubr.bf16.gmra.mrb[24].mxu0 %v855_v42 }
  0xf5   :  { %v708_v43 = vpop.f32.mrb[0].mxu0  ;;  %v750_v44 = vpop.f32.mrb[0].mxu1 }
  0xf6   :  { %v709_v45 = vpop.f32.mrb[1].mxu0  ;;  %v751_v47 = vpop.f32.mrb[1].mxu1 }
  0xf7   :  { %v710_v48 = vadd.f32 %v709_v45, %v708_v43  ;;  %v711_v49 = vpop.f32.mrb[2].mxu0  ;;  %v752_v50 = vadd.f32 %v751_v47, %v750_v44  ;;  %v753_v51 = vpop.f32.mrb[2].mxu1 }
  0xf8   :  { %v712_v52 = vpop.f32.mrb[3].mxu0  ;;  %v754_v53 = vpop.f32.mrb[3].mxu1 }
  0xf9   :  { %v570_v54 = vadd.f32 %v710_v48, %v1002_v46  ;;  %v713_v55 = vadd.f32 %v712_v52, %v711_v49  ;;  %v584_v56 = vadd.f32 %v752_v50, %v1002_v46  ;;  %v755_v57 = vadd.f32 %v754_v53, %v753_v51 }
  0xfb   :  { %v595_v58 = vmax.f32 %v570_v54, 0.0  ;;  %v571_v59 = vadd.f32 %v713_v55, %v1002_v46  ;;  %v609_v60 = vmax.f32 %v584_v56, 0.0  ;;  %v585_v61 = vadd.f32 %v755_v57, %v1002_v46 }
  0xfd   :  { %620 = vst [vmem:[%s1107_s3] sm:$0xff] %v595_v58  ;;  %v596_v62 = vmax.f32 %v571_v59, 0.0  ;;  %v714_v63 = vpop.f32.mrb[4].mxu0  ;;  %634 = vst [vmem:[%s1107_s3 + $0x70] sm:$0xff] %v609_v60  ;;  %v610_v0 = vmax.f32 %v585_v61, 0.0  ;;  %v756_v1 = vpop.f32.mrb[4].mxu1 }
  0xfe   :  { %v715_v2 = vpop.f32.mrb[5].mxu0  ;;  %v757_v3 = vpop.f32.mrb[5].mxu1 }
  0xff   :  { %621 = vst [vmem:[%s1107_s3 + $0x8] sm:$0xff] %v596_v62  ;;  %v716_v4 = vadd.f32 %v715_v2, %v714_v63  ;;  %v717_v5 = vpop.f32.mrb[6].mxu0  ;;  %635 = vst [vmem:[%s1107_s3 + $0x78] sm:$0xff] %v610_v0  ;;  %v758_v6 = vadd.f32 %v757_v3, %v756_v1  ;;  %v759_v7 = vpop.f32.mrb[6].mxu1 }
 0x100   :  { %v718_v8 = vpop.f32.mrb[7].mxu0  ;;  %v760_v9 = vpop.f32.mrb[7].mxu1 }
 0x101   :  { %v572_v10 = vadd.f32 %v716_v4, %v1002_v46  ;;  %v719_v11 = vadd.f32 %v718_v8, %v717_v5  ;;  %v586_v12 = vadd.f32 %v758_v6, %v1002_v46  ;;  %v761_v13 = vadd.f32 %v760_v9, %v759_v7 }
 0x103   :  { %v597_v14 = vmax.f32 %v572_v10, 0.0  ;;  %v573_v15 = vadd.f32 %v719_v11, %v1002_v46  ;;  %v611_v16 = vmax.f32 %v586_v12, 0.0  ;;  %v587_v17 = vadd.f32 %v761_v13, %v1002_v46 }
 0x105   :  { %622 = vst [vmem:[%s1107_s3 + $0x10] sm:$0xff] %v597_v14  ;;  %v598_v18 = vmax.f32 %v573_v15, 0.0  ;;  %v720_v19 = vpop.f32.mrb[8].mxu0  ;;  %636 = vst [vmem:[%s1107_s3 + $0x80] sm:$0xff] %v611_v16  ;;  %v612_v20 = vmax.f32 %v587_v17, 0.0  ;;  %v762_v21 = vpop.f32.mrb[8].mxu1 }
 0x106   :  { %v721_v22 = vpop.f32.mrb[9].mxu0  ;;  %v763_v23 = vpop.f32.mrb[9].mxu1 }
 0x107   :  { %623 = vst [vmem:[%s1107_s3 + $0x18] sm:$0xff] %v598_v18  ;;  %v722_v24 = vadd.f32 %v721_v22, %v720_v19  ;;  %v723_v25 = vpop.f32.mrb[10].mxu0  ;;  %637 = vst [vmem:[%s1107_s3 + $0x88] sm:$0xff] %v612_v20  ;;  %v764_v26 = vadd.f32 %v763_v23, %v762_v21  ;;  %v765_v27 = vpop.f32.mrb[10].mxu1 }
 0x108   :  { %v724_v28 = vpop.f32.mrb[11].mxu0  ;;  %v766_v29 = vpop.f32.mrb[11].mxu1 }
 0x109   :  { %v574_v30 = vadd.f32 %v722_v24, %v1002_v46  ;;  %v725_v31 = vadd.f32 %v724_v28, %v723_v25  ;;  %v588_v32 = vadd.f32 %v764_v26, %v1002_v46  ;;  %v767_v33 = vadd.f32 %v766_v29, %v765_v27 }
 0x10b   :  { %v599_v34 = vmax.f32 %v574_v30, 0.0  ;;  %v575_v35 = vadd.f32 %v725_v31, %v1002_v46  ;;  %v613_v36 = vmax.f32 %v588_v32, 0.0  ;;  %v589_v37 = vadd.f32 %v767_v33, %v1002_v46 }
 0x10d   :  { %624 = vst [vmem:[%s1107_s3 + $0x20] sm:$0xff] %v599_v34  ;;  %v600_v38 = vmax.f32 %v575_v35, 0.0  ;;  %v726_v39 = vpop.f32.mrb[12].mxu0  ;;  %638 = vst [vmem:[%s1107_s3 + $0x90] sm:$0xff] %v613_v36  ;;  %v614_v40 = vmax.f32 %v589_v37, 0.0  ;;  %v768_v41 = vpop.f32.mrb[12].mxu1 }
 0x10e   :  { %v727_v42 = vpop.f32.mrb[13].mxu0  ;;  %v769_v43 = vpop.f32.mrb[13].mxu1 }
 0x10f   :  { %625 = vst [vmem:[%s1107_s3 + $0x28] sm:$0xff] %v600_v38  ;;  %v728_v44 = vadd.f32 %v727_v42, %v726_v39  ;;  %v729_v45 = vpop.f32.mrb[14].mxu0  ;;  %639 = vst [vmem:[%s1107_s3 + $0x98] sm:$0xff] %v614_v40  ;;  %v770_v47 = vadd.f32 %v769_v43, %v768_v41  ;;  %v771_v48 = vpop.f32.mrb[14].mxu1 }
 0x110   :  { %v730_v49 = vpop.f32.mrb[15].mxu0  ;;  %v772_v50 = vpop.f32.mrb[15].mxu1 }
 0x111   :  { %v576_v51 = vadd.f32 %v728_v44, %v1002_v46  ;;  %v731_v52 = vadd.f32 %v730_v49, %v729_v45  ;;  %v590_v53 = vadd.f32 %v770_v47, %v1002_v46  ;;  %v773_v54 = vadd.f32 %v772_v50, %v771_v48 }
 0x113   :  { %v601_v55 = vmax.f32 %v576_v51, 0.0  ;;  %v577_v56 = vadd.f32 %v731_v52, %v1002_v46  ;;  %v615_v57 = vmax.f32 %v590_v53, 0.0  ;;  %v591_v58 = vadd.f32 %v773_v54, %v1002_v46 }
 0x115   :  { %626 = vst [vmem:[%s1107_s3 + $0x30] sm:$0xff] %v601_v55  ;;  %v602_v59 = vmax.f32 %v577_v56, 0.0  ;;  %v732_v60 = vpop.f32.mrb[16].mxu0  ;;  %640 = vst [vmem:[%s1107_s3 + $0xa0] sm:$0xff] %v615_v57  ;;  %v616_v61 = vmax.f32 %v591_v58, 0.0  ;;  %v774_v62 = vpop.f32.mrb[16].mxu1 }
 0x116   :  { %v733_v63 = vpop.f32.mrb[17].mxu0  ;;  %v775_v0 = vpop.f32.mrb[17].mxu1 }
 0x117   :  { %627 = vst [vmem:[%s1107_s3 + $0x38] sm:$0xff] %v602_v59  ;;  %v734_v1 = vadd.f32 %v733_v63, %v732_v60  ;;  %v735_v2 = vpop.f32.mrb[18].mxu0  ;;  %641 = vst [vmem:[%s1107_s3 + $0xa8] sm:$0xff] %v616_v61  ;;  %v776_v3 = vadd.f32 %v775_v0, %v774_v62  ;;  %v777_v4 = vpop.f32.mrb[18].mxu1 }
 0x118   :  { %v736_v5 = vpop.f32.mrb[19].mxu0  ;;  %v778_v6 = vpop.f32.mrb[19].mxu1 }
 0x119   :  { %v578_v7 = vadd.f32 %v734_v1, %v1002_v46  ;;  %v737_v8 = vadd.f32 %v736_v5, %v735_v2  ;;  %v592_v9 = vadd.f32 %v776_v3, %v1002_v46  ;;  %v779_v10 = vadd.f32 %v778_v6, %v777_v4 }
 0x11b   :  { %v603_v11 = vmax.f32 %v578_v7, 0.0  ;;  %v579_v12 = vadd.f32 %v737_v8, %v1002_v46  ;;  %v617_v13 = vmax.f32 %v592_v9, 0.0  ;;  %v593_v14 = vadd.f32 %v779_v10, %v1002_v46 }
 0x11d   :  { %628 = vst [vmem:[%s1107_s3 + $0x40] sm:$0xff] %v603_v11  ;;  %v604_v15 = vmax.f32 %v579_v12, 0.0  ;;  %v738_v16 = vpop.f32.mrb[20].mxu0  ;;  %642 = vst [vmem:[%s1107_s3 + $0xb0] sm:$0xff] %v617_v13  ;;  %v618_v17 = vmax.f32 %v593_v14, 0.0  ;;  %v780_v18 = vpop.f32.mrb[20].mxu1 }
 0x11e   :  { %v739_v19 = vpop.f32.mrb[21].mxu0  ;;  %v781_v20 = vpop.f32.mrb[21].mxu1 }
 0x11f   :  { %629 = vst [vmem:[%s1107_s3 + $0x48] sm:$0xff] %v604_v15  ;;  %v740_v21 = vadd.f32 %v739_v19, %v738_v16  ;;  %v741_v22 = vpop.f32.mrb[22].mxu0  ;;  %643 = vst [vmem:[%s1107_s3 + $0xb8] sm:$0xff] %v618_v17  ;;  %v782_v23 = vadd.f32 %v781_v20, %v780_v18  ;;  %v783_v24 = vpop.f32.mrb[22].mxu1 }
 0x120   :  { %v742_v25 = vpop.f32.mrb[23].mxu0  ;;  %v784_v26 = vpop.f32.mrb[23].mxu1 }
 0x121   :  { %v580_v27 = vadd.f32 %v740_v21, %v1002_v46  ;;  %v743_v28 = vadd.f32 %v742_v25, %v741_v22  ;;  %v594_v29 = vadd.f32 %v782_v23, %v1002_v46 }
 0x123   :  { %v605_v30 = vmax.f32 %v580_v27, 0.0  ;;  %v581_v31 = vadd.f32 %v743_v28, %v1002_v46  ;;  %v619_v32 = vmax.f32 %v594_v29, 0.0 }
 0x125   :  { %630 = vst [vmem:[%s1107_s3 + $0x50] sm:$0xff] %v605_v30  ;;  %v606_v33 = vmax.f32 %v581_v31, 0.0  ;;  %v744_v34 = vpop.f32.mrb[24].mxu0  ;;  %644 = vst [vmem:[%s1107_s3 + $0xc0] sm:$0xff] %v619_v32 }
 0x126   :  { %v745_v35 = vpop.f32.mrb[25].mxu0 }
 0x127   :  { %631 = vst [vmem:[%s1107_s3 + $0x58] sm:$0xff] %v606_v33  ;;  %v746_v36 = vadd.f32 %v745_v35, %v744_v34  ;;  %v747_v37 = vpop.f32.mrb[26].mxu0 }
 0x128   :  { %v748_v38 = vpop.f32.mrb[27].mxu0 }
 0x129   :  { %v582_v39 = vadd.f32 %v746_v36, %v1002_v46  ;;  %v749_v40 = vadd.f32 %v748_v38, %v747_v37 }
 0x12b   :  { %v607_v41 = vmax.f32 %v582_v39, 0.0  ;;  %v583_v42 = vadd.f32 %v749_v40, %v1002_v46 }
 0x12d   :  { %632 = vst [vmem:[%s1107_s3 + $0x60] sm:$0xff] %v607_v41  ;;  %v608_v43 = vmax.f32 %v583_v42, 0.0 }
 0x12f   :  { %633 = vst [vmem:[%s1107_s3 + $0x68] sm:$0xff] %v608_v43 }

// kernel: cnn_forward.5
= control target key start
LH: loop header
LB: loop body
LE: loop exit
PB: predicated region body
PF: predicated region fallthrough
CT: control target
= control target key end

     0   :  { %s763_s1 = inlined_call_operand.vmem [shape: bf16[512,128], index: 1, kind: input, shape index: {}]   ;;  %s764_s0 = inlined_call_operand.vmem [shape: bf16[32,512], index: 0, kind: input, shape index: {}]   ;;  %s765_s2 = inlined_call_operand.vmem [shape: f32[1,128], index: 2, kind: input, shape index: {}]   ;;  %s766_s3 = inlined_call_operand.vmem [shape: f32[32,128], index: 3, kind: output, shape index: {}]  }
   0x1   :  { %v564_v0 = vld [vmem:[%s763_s1 + $0x40] sm:$0xff]   ;;  %v568_v4 = vld [vmem:[%s763_s1 + $0x48] sm:$0xff]   ;;  %v572_v8 = vld [vmem:[%s763_s1 + $0x50] sm:$0xff]  }
   0x2   :  { %v565_v1 = vld [vmem:[%s763_s1 + $0xc0] sm:$0xff]   ;;  %508 = vmatprep.subr.bf16.mxu0 %v564_v0  ;;  %v569_v5 = vld [vmem:[%s763_s1 + $0xc8] sm:$0xff]   ;;  %v573_v9 = vld [vmem:[%s763_s1 + $0xd0] sm:$0xff]  }
   0x3   :  { %v566_v2 = vld [vmem:[%s763_s1] sm:$0xff]   ;;  %536 = vmatprep.subr.bf16.mxu1 %v565_v1  ;;  %v570_v6 = vld [vmem:[%s763_s1 + $0x8] sm:$0xff]   ;;  %v574_v10 = vld [vmem:[%s763_s1 + $0x10] sm:$0xff]  }
   0x4   :  { %v567_v3 = vld [vmem:[%s763_s1 + $0x80] sm:$0xff]   ;;  %509 = vmatpush3.bf16.msra.mxu0 %v566_v2  ;;  %v571_v7 = vld [vmem:[%s763_s1 + $0x88] sm:$0xff]   ;;  %v575_v11 = vld [vmem:[%s763_s1 + $0x90] sm:$0xff]  }
   0x5   :  { %537 = vmatpush3.bf16.msra.mxu1 %v567_v3  ;;  %510 = vmatprep.subr.bf16.mxu0 %v568_v4  ;;  %v576_v12 = vld [vmem:[%s763_s1 + $0x58] sm:$0xff]   ;;  %v580_v16 = vld [vmem:[%s763_s1 + $0x60] sm:$0xff]   ;;  %v584_v20 = vld [vmem:[%s763_s1 + $0x68] sm:$0xff]  }
   0x6   :  { %538 = vmatprep.subr.bf16.mxu1 %v569_v5  ;;  %v577_v13 = vld [vmem:[%s763_s1 + $0xd8] sm:$0xff]   ;;  %v581_v17 = vld [vmem:[%s763_s1 + $0xe0] sm:$0xff]   ;;  %v585_v21 = vld [vmem:[%s763_s1 + $0xe8] sm:$0xff]  }
   0x7   :  { %v578_v14 = vld [vmem:[%s763_s1 + $0x18] sm:$0xff]   ;;  %v582_v18 = vld [vmem:[%s763_s1 + $0x20] sm:$0xff]   ;;  %v586_v22 = vld [vmem:[%s763_s1 + $0x28] sm:$0xff]  }
   0x8   :  { %511 = vmatpush3.bf16.msra.mxu0 %v570_v6  ;;  %v579_v15 = vld [vmem:[%s763_s1 + $0x98] sm:$0xff]   ;;  %v583_v19 = vld [vmem:[%s763_s1 + $0xa0] sm:$0xff]   ;;  %v587_v23 = vld [vmem:[%s763_s1 + $0xa8] sm:$0xff]  }
   0x9   :  { %539 = vmatpush3.bf16.msra.mxu1 %v571_v7  ;;  %512 = vmatprep.subr.bf16.mxu0 %v572_v8  ;;  %v588_v24 = vld [vmem:[%s763_s1 + $0x70] sm:$0xff]   ;;  %v592_v28 = vld [vmem:[%s763_s1 + $0x78] sm:$0xff]   ;;  %v507_v49 = vld [vmem:[%s765_s2] ss:$0 sm:$0xff] }
   0xa   :  { %540 = vmatprep.subr.bf16.mxu1 %v573_v9  ;;  %v589_v25 = vld [vmem:[%s763_s1 + $0xf0] sm:$0xff]   ;;  %v593_v29 = vld [vmem:[%s763_s1 + $0xf8] sm:$0xff]  }
   0xb   :  { %v590_v26 = vld [vmem:[%s763_s1 + $0x30] sm:$0xff]   ;;  %v594_v30 = vld [vmem:[%s763_s1 + $0x38] sm:$0xff]  }
   0xc   :  { %513 = vmatpush3.bf16.msra.mxu0 %v574_v10  ;;  %v591_v27 = vld [vmem:[%s763_s1 + $0xb0] sm:$0xff]   ;;  %v595_v31 = vld [vmem:[%s763_s1 + $0xb8] sm:$0xff]  }
   0xd   :  { %541 = vmatpush3.bf16.msra.mxu1 %v575_v11  ;;  %514 = vmatprep.subr.bf16.mxu0 %v576_v12  ;;  %v596_v32 = vld [vmem:[%s764_s0] ss:$16 sps:$4 sm:$0xff]   ;;  %v598_v33 = vld [vmem:[%s764_s0 + $0x4] ss:$16 sps:$4 sm:$0xff]   ;;  %v599_v34 = vld [vmem:[%s764_s0 + $0x8] ss:$16 sps:$4 sm:$0xff]  }
   0xe   :  { %542 = vmatprep.subr.bf16.mxu1 %v577_v13  ;;  %v601_v35 = vld [vmem:[%s764_s0 + $0xc] ss:$16 sps:$4 sm:$0xff]   ;;  %363 = vmatprep.mubr.bf16.mxu0 %v598_v33  ;;  %v602_v36 = vld [vmem:[%s764_s0 + $0x24] ss:$16 sps:$4 sm:$0xff]   ;;  %v606_v38 = vld [vmem:[%s764_s0 + $0x20] ss:$16 sps:$4 sm:$0xff]  }
   0xf   :  { %412 = vmatprep.mubr.bf16.mxu1 %v601_v35  ;;  %v604_v37 = vld [vmem:[%s764_s0 + $0x2c] ss:$16 sps:$4 sm:$0xff]   ;;  %v607_v39 = vld [vmem:[%s764_s0 + $0x28] ss:$16 sps:$4 sm:$0xff]  }
  0x10   :  { %515 = vmatpush3.bf16.msra.mxu0 %v578_v14 }
  0x11   :  { %543 = vmatpush3.bf16.msra.mxu1 %v579_v15  ;;  %516 = vmatprep.subr.bf16.mxu0 %v580_v16 }
  0x12   :  { %544 = vmatprep.subr.bf16.mxu1 %v581_v17 }
  0x14   :  { %517 = vmatpush3.bf16.msra.mxu0 %v582_v18 }
  0x15   :  { %545 = vmatpush3.bf16.msra.mxu1 %v583_v19  ;;  %518 = vmatprep.subr.bf16.mxu0 %v584_v20 }
  0x16   :  { %546 = vmatprep.subr.bf16.mxu1 %v585_v21 }
  0x18   :  { %519 = vmatpush3.bf16.msra.mxu0 %v586_v22 }
  0x19   :  { %547 = vmatpush3.bf16.msra.mxu1 %v587_v23  ;;  %520 = vmatprep.subr.bf16.mxu0 %v588_v24 }
  0x1a   :  { %548 = vmatprep.subr.bf16.mxu1 %v589_v25 }
  0x1c   :  { %521 = vmatpush3.bf16.msra.mxu0 %v590_v26 }
  0x1d   :  { %549 = vmatpush3.bf16.msra.mxu1 %v591_v27  ;;  %522 = vmatprep.subr.bf16.mxu0 %v592_v28 }
  0x1e   :  { %550 = vmatprep.subr.bf16.mxu1 %v593_v29 }
  0x20   :  { %523 = vmatpush3.bf16.msra.mxu0 %v594_v30 }
  0x21   :  { %551 = vmatpush3.bf16.msra.mxu1 %v595_v31 }
  0x23   :  { %364 = vmatmul.mubr.bf16.vlgmr.msra.gmra.mrb[0].mxu0 %v596_v32 }
  0x24   :  { %413 = vmatmul.mubr.bf16.vlgmr.msra.gmra.mrb[0].mxu1 %v599_v34  ;;  %371 = vmatprep.mubr.bf16.mxu0 %v602_v36 }
  0x25   :  { %420 = vmatprep.mubr.bf16.mxu1 %v604_v37 }
  0x2b   :  { %372 = vmatmul.mubr.bf16.gmra.mrb[4].mxu0 %v606_v38 }
  0x2c   :  { %421 = vmatmul.mubr.bf16.gmra.mrb[4].mxu1 %v607_v39 }
  0xf6   :  { %v524_v40 = vpop.f32.mrb[0].mxu0 }
  0xf7   :  { %v552_v41 = vpop.f32.mrb[0].mxu1  ;;  %v525_v42 = vpop.f32.mrb[1].mxu0 }
  0xf8   :  { %v526_v43 = vadd.f32 %v525_v42, %v524_v40  ;;  %v553_v44 = vpop.f32.mrb[1].mxu1  ;;  %v527_v45 = vpop.f32.mrb[2].mxu0 }
  0xf9   :  { %v554_v46 = vadd.f32 %v553_v44, %v552_v41  ;;  %v555_v47 = vpop.f32.mrb[2].mxu1  ;;  %v528_v48 = vpop.f32.mrb[3].mxu0 }
  0xfa   :  { %v529_v50 = vadd.f32 %v528_v48, %v527_v45  ;;  %v556_v51 = vpop.f32.mrb[3].mxu1 }
  0xfb   :  { %v415_v52 = vadd.f32 %v554_v46, %v526_v43  ;;  %v557_v53 = vadd.f32 %v556_v51, %v555_v47 }
  0xfd   :  { %v451_v54 = vadd.f32 %v507_v49, %v415_v52  ;;  %v418_v55 = vadd.f32 %v557_v53, %v529_v50 }
  0xfe   :  { %v530_v56 = vpop.f32.mrb[4].mxu0 }
  0xff   :  { %v455_v57 = vmax.f32 %v451_v54, 0.0  ;;  %v452_v58 = vadd.f32 %v507_v49, %v418_v55  ;;  %v558_v59 = vpop.f32.mrb[4].mxu1  ;;  %v531_v60 = vpop.f32.mrb[5].mxu0 }
 0x100   :  { %v532_v61 = vadd.f32 %v531_v60, %v530_v56  ;;  %v559_v62 = vpop.f32.mrb[5].mxu1  ;;  %v533_v63 = vpop.f32.mrb[6].mxu0 }
 0x101   :  { %459 = vst [vmem:[%s766_s3] sm:$0xff] %v455_v57  ;;  %v456_v0 = vmax.f32 %v452_v58, 0.0  ;;  %v560_v1 = vadd.f32 %v559_v62, %v558_v59  ;;  %v561_v2 = vpop.f32.mrb[6].mxu1  ;;  %v534_v3 = vpop.f32.mrb[7].mxu0 }
 0x102   :  { %v535_v4 = vadd.f32 %v534_v3, %v533_v63  ;;  %v562_v5 = vpop.f32.mrb[7].mxu1 }
 0x103   :  { %460 = vst [vmem:[%s766_s3 + $0x8] sm:$0xff] %v456_v0  ;;  %v423_v6 = vadd.f32 %v560_v1, %v532_v61  ;;  %v563_v7 = vadd.f32 %v562_v5, %v561_v2 }
 0x105   :  { %v453_v8 = vadd.f32 %v507_v49, %v423_v6  ;;  %v426_v9 = vadd.f32 %v563_v7, %v535_v4 }
 0x107   :  { %v457_v10 = vmax.f32 %v453_v8, 0.0  ;;  %v454_v11 = vadd.f32 %v507_v49, %v426_v9 }
 0x109   :  { %461 = vst [vmem:[%s766_s3 + $0x10] sm:$0xff] %v457_v10  ;;  %v458_v12 = vmax.f32 %v454_v11, 0.0 }
 0x10b   :  { %462 = vst [vmem:[%s766_s3 + $0x18] sm:$0xff] %v458_v12 }

// kernel: cnn_forward.6
= control target key start
LH: loop header
LB: loop body
LE: loop exit
PB: predicated region body
PF: predicated region fallthrough
CT: control target
= control target key end

     0   :  { %v668_v36 = vmov 0.0   ;;  %vm669_vm0 = vmmov 0   ;;  %s825_s1 = inlined_call_operand.vmem [shape: bf16[640,128], index: 1, kind: input, shape index: {}]   ;;  %s826_s0 = inlined_call_operand.vmem [shape: bf16[8,640], index: 0, kind: input, shape index: {}]   ;;  %s827_s2 = inlined_call_operand.vmem [shape: f32[1,128], index: 2, kind: input, shape index: {}]   ;;  %s828_s3 = inlined_call_operand.vmem [shape: f32[8,128], index: 3, kind: output, shape index: {}]  }
   0x1   :  { %v623_v0 = vld [vmem:[%s825_s1 + $0x40] sm:$0xff]   ;;  %v627_v4 = vld [vmem:[%s825_s1 + $0x48] sm:$0xff]   ;;  %v631_v8 = vld [vmem:[%s825_s1 + $0x50] sm:$0xff]  }
   0x2   :  { %v624_v1 = vld [vmem:[%s825_s1 + $0xc0] sm:$0xff]   ;;  %548 = vmatprep.subr.bf16.mxu0 %v623_v0  ;;  %v628_v5 = vld [vmem:[%s825_s1 + $0xc8] sm:$0xff]   ;;  %v632_v9 = vld [vmem:[%s825_s1 + $0xd0] sm:$0xff]  }
   0x3   :  { %v625_v2 = vld [vmem:[%s825_s1] sm:$0xff]   ;;  %570 = vmatprep.subr.bf16.mxu1 %v624_v1  ;;  %v629_v6 = vld [vmem:[%s825_s1 + $0x8] sm:$0xff]   ;;  %v633_v10 = vld [vmem:[%s825_s1 + $0x10] sm:$0xff]  }
   0x4   :  { %v626_v3 = vld [vmem:[%s825_s1 + $0x80] sm:$0xff]   ;;  %549 = vmatpush3.bf16.msra.mxu0 %v625_v2  ;;  %v630_v7 = vld [vmem:[%s825_s1 + $0x88] sm:$0xff]   ;;  %v634_v11 = vld [vmem:[%s825_s1 + $0x90] sm:$0xff]  }
   0x5   :  { %571 = vmatpush3.bf16.msra.mxu1 %v626_v3  ;;  %550 = vmatprep.subr.bf16.mxu0 %v627_v4  ;;  %v635_v12 = vld [vmem:[%s825_s1 + $0x58] sm:$0xff]   ;;  %v639_v16 = vld [vmem:[%s825_s1 + $0x60] sm:$0xff]   ;;  %v643_v20 = vld [vmem:[%s825_s1 + $0x68] sm:$0xff]  }
   0x6   :  { %572 = vmatprep.subr.bf16.mxu1 %v628_v5  ;;  %v636_v13 = vld [vmem:[%s825_s1 + $0xd8] sm:$0xff]   ;;  %v640_v17 = vld [vmem:[%s825_s1 + $0xe0] sm:$0xff]   ;;  %v644_v21 = vld [vmem:[%s825_s1 + $0xe8] sm:$0xff]  }
   0x7   :  { %v637_v14 = vld [vmem:[%s825_s1 + $0x18] sm:$0xff]   ;;  %v641_v18 = vld [vmem:[%s825_s1 + $0x20] sm:$0xff]   ;;  %v645_v22 = vld [vmem:[%s825_s1 + $0x28] sm:$0xff]  }
   0x8   :  { %551 = vmatpush3.bf16.msra.mxu0 %v629_v6  ;;  %v638_v15 = vld [vmem:[%s825_s1 + $0x98] sm:$0xff]   ;;  %v642_v19 = vld [vmem:[%s825_s1 + $0xa0] sm:$0xff]   ;;  %v646_v23 = vld [vmem:[%s825_s1 + $0xa8] sm:$0xff]  }
   0x9   :  { %573 = vmatpush3.bf16.msra.mxu1 %v630_v7  ;;  %552 = vmatprep.subr.bf16.mxu0 %v631_v8  ;;  %v647_v24 = vld [vmem:[%s825_s1 + $0x70] sm:$0xff]   ;;  %v651_v28 = vld [vmem:[%s825_s1 + $0x78] sm:$0xff]   ;;  %v21_v32 = vld [vmem:[%s826_s0] sm:$0xff] }
   0xa   :  { %574 = vmatprep.subr.bf16.mxu1 %v632_v9  ;;  %v648_v25 = vld [vmem:[%s825_s1 + $0xf0] sm:$0xff]   ;;  %v652_v29 = vld [vmem:[%s825_s1 + $0xf8] sm:$0xff]   ;;  %v502_v33 = vcombine.low %v21_v32, %v21_v32  ;;  %v503_v34 = vcombine.high %v21_v32, %v21_v32  ;;  %v22_v35 = vld [vmem:[%s826_s0 + $0x8] sm:$0xff] }
   0xb   :  { %v649_v26 = vld [vmem:[%s825_s1 + $0x30] sm:$0xff]   ;;  %v653_v30 = vld [vmem:[%s825_s1 + $0x38] sm:$0xff]   ;;  %v504_v37 = vcombine.low %v22_v35, %v22_v35  ;;  %v505_v38 = vcombine.high %v22_v35, %v22_v35  ;;  %v660_v39 = vld [vmem:[%s825_s1 + $0x100] sm:$0xff]  }
   0xc   :  { %553 = vmatpush3.bf16.msra.mxu0 %v633_v10  ;;  %v650_v27 = vld [vmem:[%s825_s1 + $0xb0] sm:$0xff]   ;;  %v654_v31 = vld [vmem:[%s825_s1 + $0xb8] sm:$0xff]   ;;  %394 = vmatprep.mubr.bf16.mxu0 %v503_v34  ;;  %v661_v40 = vld [vmem:[%s825_s1 + $0x108] sm:$0xff]  }
   0xd   :  { %575 = vmatpush3.bf16.msra.mxu1 %v634_v11  ;;  %554 = vmatprep.subr.bf16.mxu0 %v635_v12  ;;  %v662_v41 = vld [vmem:[%s825_s1 + $0x110] sm:$0xff]   ;;  %v663_v42 = vld [vmem:[%s825_s1 + $0x118] sm:$0xff]   ;;  %v664_v43 = vld [vmem:[%s825_s1 + $0x120] sm:$0xff]  }
   0xe   :  { %576 = vmatprep.subr.bf16.mxu1 %v636_v13  ;;  %434 = vmatprep.mubr.bf16.mxu1 %v505_v38  ;;  %v665_v44 = vld [vmem:[%s825_s1 + $0x128] sm:$0xff]   ;;  %v666_v45 = vld [vmem:[%s825_s1 + $0x130] sm:$0xff]   ;;  %v667_v46 = vld [vmem:[%s825_s1 + $0x138] sm:$0xff]  }
   0xf   :  { %v657_v47 = vld [vmem:[%s826_s0 + $0x10] ss:$0 sps:$4 sm:$0xff]   ;;  %v547_v60 = vld [vmem:[%s827_s2] ss:$0 sm:$0xff] }
  0x10   :  { %555 = vmatpush3.bf16.msra.mxu0 %v637_v14 }
  0x11   :  { %577 = vmatpush3.bf16.msra.mxu1 %v638_v15  ;;  %556 = vmatprep.subr.bf16.mxu0 %v639_v16 }
  0x12   :  { %578 = vmatprep.subr.bf16.mxu1 %v640_v17 }
  0x14   :  { %557 = vmatpush3.bf16.msra.mxu0 %v641_v18 }
  0x15   :  { %579 = vmatpush3.bf16.msra.mxu1 %v642_v19  ;;  %558 = vmatprep.subr.bf16.mxu0 %v643_v20 }
  0x16   :  { %580 = vmatprep.subr.bf16.mxu1 %v644_v21 }
  0x18   :  { %559 = vmatpush3.bf16.msra.mxu0 %v645_v22 }
  0x19   :  { %581 = vmatpush3.bf16.msra.mxu1 %v646_v23  ;;  %560 = vmatprep.subr.bf16.mxu0 %v647_v24 }
  0x1a   :  { %582 = vmatprep.subr.bf16.mxu1 %v648_v25 }
  0x1c   :  { %561 = vmatpush3.bf16.msra.mxu0 %v649_v26 }
  0x1d   :  { %583 = vmatpush3.bf16.msra.mxu1 %v650_v27  ;;  %562 = vmatprep.subr.bf16.mxu0 %v651_v28 }
  0x1e   :  { %584 = vmatprep.subr.bf16.mxu1 %v652_v29 }
  0x20   :  { %563 = vmatpush3.bf16.msra.mxu0 %v653_v30 }
  0x21   :  { %585 = vmatpush3.bf16.msra.mxu1 %v654_v31  ;;  %601 = vmatprep.subr.bf16.mxu0 %v668_v36 }
  0x23   :  { %395 = vmatmul.mubr.bf16.vlgmr.msra.gmra.mrb[0].mxu0 %v502_v33 }
  0x24   :  { %435 = vmatmul.mubr.bf16.vlgmr.msra.gmra.mrb[0].mxu1 %v504_v37  ;;  %602 = vmatpush3.bf16.msra.mxu0 %v660_v39 }
  0x25   :  { %603 = vmatprep.subr.bf16.mxu0 %v668_v36  ;;  %617 = vmatprep.mubr.msk.bf16.mxu0 %vm669_vm0, %v668_v36 }
  0x28   :  { %604 = vmatpush3.bf16.msra.mxu0 %v661_v40 }
  0x29   :  { %605 = vmatprep.subr.bf16.mxu0 %v668_v36 }
  0x2c   :  { %606 = vmatpush3.bf16.msra.mxu0 %v662_v41 }
  0x2d   :  { %607 = vmatprep.subr.bf16.mxu0 %v668_v36 }
  0x30   :  { %608 = vmatpush3.bf16.msra.mxu0 %v663_v42 }
  0x31   :  { %609 = vmatprep.subr.bf16.mxu0 %v668_v36 }
  0x34   :  { %610 = vmatpush3.bf16.msra.mxu0 %v664_v43 }
  0x35   :  { %611 = vmatprep.subr.bf16.mxu0 %v668_v36 }
  0x38   :  { %612 = vmatpush3.bf16.msra.mxu0 %v665_v44 }
  0x39   :  { %613 = vmatprep.subr.bf16.mxu0 %v668_v36 }
  0x3c   :  { %614 = vmatpush3.bf16.msra.mxu0 %v666_v45 }
  0x3d   :  { %615 = vmatprep.subr.bf16.mxu0 %v668_v36 }
  0x40   :  { %616 = vmatpush3.bf16.msra.mxu0 %v667_v46 }
  0x43   :  { %618 = vmatmul.mubr.bf16.vlgmr.msra.gmra.mrb[4].mxu0 %v657_v47 }
  0xf6   :  { %v564_v48 = vpop.f32.mrb[0].mxu0 }
  0xf7   :  { %v586_v49 = vpop.f32.mrb[0].mxu1  ;;  %v565_v50 = vpop.f32.mrb[1].mxu0 }
  0xf8   :  { %v566_v51 = vadd.f32 %v565_v50, %v564_v48  ;;  %v587_v52 = vpop.f32.mrb[1].mxu1  ;;  %v567_v53 = vpop.f32.mrb[2].mxu0 }
  0xf9   :  { %v588_v54 = vadd.f32 %v587_v52, %v586_v49  ;;  %v568_v55 = vpop.f32.mrb[3].mxu0  ;;  %v589_v56 = vpop.f32.mrb[2].mxu1 }
  0xfa   :  { %v590_v57 = vpop.f32.mrb[3].mxu1 }
  0xfb   :  { %v437_v58 = vadd.f32 %v588_v54, %v566_v51 }
 0x116   :  { %v476_v59 = vpop.f32.mrb[4].mxu0 }
 0x117   :  { %v477_v61 = vadd.f32 %v476_v59, %v437_v58  ;;  %v619_v62 = vpop.f32.mrb[5].mxu0 }
 0x118   :  { %v479_v63 = vpop.f32.mrb[6].mxu0 }
 0x119   :  { %v495_v0 = vadd.f32 %v547_v60, %v477_v61  ;;  %v620_v1 = vpop.f32.mrb[7].mxu0 }
 0x11b   :  { %v496_v2 = vmax.f32 %v495_v0, 0.0 }
 0x11d   :  { %497 = vst [vmem:[%s828_s3] sm:$0xff] %v496_v2 }

// kernel: cnn_forward.7
= control target key start
LH: loop header
LB: loop body
LE: loop exit
PB: predicated region body
PF: predicated region fallthrough
CT: control target
= control target key end

     0   :  { %s1476_s1 = inlined_call_operand.vmem [shape: bf16[256,512], index: 1, kind: input, shape index: {}]   ;;  %s1477_s0 = inlined_call_operand.vmem [shape: bf16[8,256], index: 0, kind: input, shape index: {}]   ;;  %s1478_s3 = inlined_call_operand.vmem [shape: bf16[512,128], index: 3, kind: input, shape index: {}]   ;;  %s1479_s2 = inlined_call_operand.vmem [shape: f32[1,512], index: 2, kind: input, shape index: {}]   ;;  %s1480_s4 = inlined_call_operand.vmem [shape: f32[1,128], index: 4, kind: input, shape index: {}]   ;;  %s1481_s5 = inlined_call_operand.vmem [shape: f32[8,128], index: 5, kind: output, shape index: {}]  }
   0x1   :  { %v1016_v0 = vld [vmem:[%s1476_s1 + $0x4] ss:$16 sps:$4 sm:$0xff]   ;;  %v1018_v1 = vld [vmem:[%s1476_s1 + $0xc] ss:$16 sps:$4 sm:$0xff]   ;;  %v1020_v2 = vld [vmem:[%s1476_s1] ss:$16 sps:$4 sm:$0xff]  }
   0x2   :  { %435 = vmatprep.subr.bf16.mxu0 %v1016_v0  ;;  %v1021_v3 = vld [vmem:[%s1476_s1 + $0x8] ss:$16 sps:$4 sm:$0xff]   ;;  %476 = vmatprep.subr.bf16.mxu1 %v1018_v1  ;;  %v1022_v4 = vld [vmem:[%s1476_s1 + $0x24] ss:$16 sps:$4 sm:$0xff]   ;;  %v1024_v5 = vld [vmem:[%s1476_s1 + $0x2c] ss:$16 sps:$4 sm:$0xff]  }
   0x3   :  { %436 = vmatpush1.bf16.msra.mxu0 %v1020_v2  ;;  %477 = vmatpush1.bf16.msra.mxu1 %v1021_v3  ;;  %v1026_v6 = vld [vmem:[%s1476_s1 + $0x20] ss:$16 sps:$4 sm:$0xff]   ;;  %v1027_v7 = vld [vmem:[%s1476_s1 + $0x28] ss:$16 sps:$4 sm:$0xff]   ;;  %v1028_v8 = vld [vmem:[%s1476_s1 + $0x44] ss:$16 sps:$4 sm:$0xff]  }
   0x4   :  { %437 = vmatprep.subr.bf16.mxu0 %v1022_v4  ;;  %478 = vmatprep.subr.bf16.mxu1 %v1024_v5  ;;  %v1030_v9 = vld [vmem:[%s1476_s1 + $0x4c] ss:$16 sps:$4 sm:$0xff]   ;;  %v1032_v10 = vld [vmem:[%s1476_s1 + $0x40] ss:$16 sps:$4 sm:$0xff]   ;;  %v1033_v11 = vld [vmem:[%s1476_s1 + $0x48] ss:$16 sps:$4 sm:$0xff]  }
   0x5   :  { %v1034_v12 = vld [vmem:[%s1476_s1 + $0x64] ss:$16 sps:$4 sm:$0xff]   ;;  %v1036_v13 = vld [vmem:[%s1476_s1 + $0x6c] ss:$16 sps:$4 sm:$0xff]   ;;  %v1038_v14 = vld [vmem:[%s1476_s1 + $0x60] ss:$16 sps:$4 sm:$0xff]  }
   0x6   :  { %v1039_v15 = vld [vmem:[%s1476_s1 + $0x68] ss:$16 sps:$4 sm:$0xff]   ;;  %v1040_v16 = vld [vmem:[%s1476_s1 + $0x84] ss:$16 sps:$4 sm:$0xff]   ;;  %v1042_v17 = vld [vmem:[%s1476_s1 + $0x8c] ss:$16 sps:$4 sm:$0xff]  }
   0x7   :  { %438 = vmatpush1.bf16.msra.mxu0 %v1026_v6  ;;  %479 = vmatpush1.bf16.msra.mxu1 %v1027_v7  ;;  %v1044_v18 = vld [vmem:[%s1476_s1 + $0x80] ss:$16 sps:$4 sm:$0xff]   ;;  %v1045_v19 = vld [vmem:[%s1476_s1 + $0x88] ss:$16 sps:$4 sm:$0xff]   ;;  %v1046_v20 = vld [vmem:[%s1476_s1 + $0xa4] ss:$16 sps:$4 sm:$0xff]  }
   0x8   :  { %439 = vmatprep.subr.bf16.mxu0 %v1028_v8  ;;  %480 = vmatprep.subr.bf16.mxu1 %v1030_v9  ;;  %v1048_v21 = vld [vmem:[%s1476_s1 + $0xac] ss:$16 sps:$4 sm:$0xff]   ;;  %v1050_v22 = vld [vmem:[%s1476_s1 + $0xa0] ss:$16 sps:$4 sm:$0xff]   ;;  %v1051_v23 = vld [vmem:[%s1476_s1 + $0xa8] ss:$16 sps:$4 sm:$0xff]  }
   0x9   :  { %v1052_v24 = vld [vmem:[%s1476_s1 + $0xc4] ss:$16 sps:$4 sm:$0xff]   ;;  %v1054_v25 = vld [vmem:[%s1476_s1 + $0xcc] ss:$16 sps:$4 sm:$0xff]   ;;  %v1056_v26 = vld [vmem:[%s1476_s1 + $0xc0] ss:$16 sps:$4 sm:$0xff]  }
   0xa   :  { %v1057_v27 = vld [vmem:[%s1476_s1 + $0xc8] ss:$16 sps:$4 sm:$0xff]   ;;  %v1058_v28 = vld [vmem:[%s1476_s1 + $0xe4] ss:$16 sps:$4 sm:$0xff]   ;;  %v1060_v29 = vld [vmem:[%s1476_s1 + $0xec] ss:$16 sps:$4 sm:$0xff]  }
   0xb   :  { %440 = vmatpush1.bf16.msra.mxu0 %v1032_v10  ;;  %481 = vmatpush1.bf16.msra.mxu1 %v1033_v11  ;;  %v1062_v30 = vld [vmem:[%s1476_s1 + $0xe0] ss:$16 sps:$4 sm:$0xff]   ;;  %v1063_v31 = vld [vmem:[%s1476_s1 + $0xe8] ss:$16 sps:$4 sm:$0xff]   ;;  %v1064_v32 = vld [vmem:[%s1476_s1 + $0x104] ss:$16 sps:$4 sm:$0xff]  }
   0xc   :  { %441 = vmatprep.subr.bf16.mxu0 %v1034_v12  ;;  %482 = vmatprep.subr.bf16.mxu1 %v1036_v13  ;;  %v1066_v33 = vld [vmem:[%s1476_s1 + $0x10c] ss:$16 sps:$4 sm:$0xff]   ;;  %v1068_v34 = vld [vmem:[%s1476_s1 + $0x100] ss:$16 sps:$4 sm:$0xff]   ;;  %v1069_v35 = vld [vmem:[%s1476_s1 + $0x108] ss:$16 sps:$4 sm:$0xff]  }
   0xd   :  { %v1070_v36 = vld [vmem:[%s1476_s1 + $0x124] ss:$16 sps:$4 sm:$0xff]   ;;  %v1072_v37 = vld [vmem:[%s1476_s1 + $0x12c] ss:$16 sps:$4 sm:$0xff]   ;;  %v1074_v38 = vld [vmem:[%s1476_s1 + $0x120] ss:$16 sps:$4 sm:$0xff]  }
   0xe   :  { %v1075_v39 = vld [vmem:[%s1476_s1 + $0x128] ss:$16 sps:$4 sm:$0xff]   ;;  %v1076_v40 = vld [vmem:[%s1476_s1 + $0x144] ss:$16 sps:$4 sm:$0xff]   ;;  %v1078_v41 = vld [vmem:[%s1476_s1 + $0x14c] ss:$16 sps:$4 sm:$0xff]  }
   0xf   :  { %442 = vmatpush1.bf16.msra.mxu0 %v1038_v14  ;;  %483 = vmatpush1.bf16.msra.mxu1 %v1039_v15  ;;  %v1080_v42 = vld [vmem:[%s1476_s1 + $0x140] ss:$16 sps:$4 sm:$0xff]   ;;  %v1081_v43 = vld [vmem:[%s1476_s1 + $0x148] ss:$16 sps:$4 sm:$0xff]   ;;  %v1082_v44 = vld [vmem:[%s1476_s1 + $0x164] ss:$16 sps:$4 sm:$0xff]  }
  0x10   :  { %443 = vmatprep.subr.bf16.mxu0 %v1040_v16  ;;  %484 = vmatprep.subr.bf16.mxu1 %v1042_v17  ;;  %v1084_v45 = vld [vmem:[%s1476_s1 + $0x16c] ss:$16 sps:$4 sm:$0xff]   ;;  %v1086_v46 = vld [vmem:[%s1476_s1 + $0x160] ss:$16 sps:$4 sm:$0xff]   ;;  %v1087_v48 = vld [vmem:[%s1476_s1 + $0x168] ss:$16 sps:$4 sm:$0xff]  }
  0x11   :  { %v21_v47 = vld [vmem:[%s1477_s0] sm:$0xff]  ;;  %v1090_v51 = vld [vmem:[%s1476_s1 + $0x18c] ss:$16 sps:$4 sm:$0xff]   ;;  %v1093_v53 = vld [vmem:[%s1476_s1 + $0x188] ss:$16 sps:$4 sm:$0xff]  }
  0x12   :  { %v874_v49 = vcombine.high %v21_v47, %v21_v47  ;;  %v1088_v50 = vld [vmem:[%s1476_s1 + $0x184] ss:$16 sps:$4 sm:$0xff]   ;;  %v1092_v52 = vld [vmem:[%s1476_s1 + $0x180] ss:$16 sps:$4 sm:$0xff]   ;;  %v1096_v55 = vld [vmem:[%s1476_s1 + $0x1ac] ss:$16 sps:$4 sm:$0xff]   ;;  %v873_v5 = vcombine.low %v21_v47, %v21_v47 }
  0x13   :  { %444 = vmatpush1.bf16.msra.mxu0 %v1044_v18  ;;  %485 = vmatpush1.bf16.msra.mxu1 %v1045_v19  ;;  %v1094_v54 = vld [vmem:[%s1476_s1 + $0x1a4] ss:$16 sps:$4 sm:$0xff]   ;;  %v1098_v56 = vld [vmem:[%s1476_s1 + $0x1a0] ss:$16 sps:$4 sm:$0xff]   ;;  %v1099_v57 = vld [vmem:[%s1476_s1 + $0x1a8] ss:$16 sps:$4 sm:$0xff]  }
  0x14   :  { %445 = vmatprep.subr.bf16.mxu0 %v1046_v20  ;;  %486 = vmatprep.subr.bf16.mxu1 %v1048_v21  ;;  %v1100_v58 = vld [vmem:[%s1476_s1 + $0x1c4] ss:$16 sps:$4 sm:$0xff]   ;;  %v1102_v59 = vld [vmem:[%s1476_s1 + $0x1cc] ss:$16 sps:$4 sm:$0xff]   ;;  %v1104_v60 = vld [vmem:[%s1476_s1 + $0x1c0] ss:$16 sps:$4 sm:$0xff]  }
  0x15   :  { %467 = vmatprep.mubr.bf16.mxu0 %v874_v49  ;;  %508 = vmatprep.mubr.bf16.mxu1 %v874_v49  ;;  %v1105_v61 = vld [vmem:[%s1476_s1 + $0x1c8] ss:$16 sps:$4 sm:$0xff]   ;;  %v1106_v62 = vld [vmem:[%s1476_s1 + $0x1e4] ss:$16 sps:$4 sm:$0xff]   ;;  %v1108_v63 = vld [vmem:[%s1476_s1 + $0x1ec] ss:$16 sps:$4 sm:$0xff]  }
  0x16   :  { %v1110_v0 = vld [vmem:[%s1476_s1 + $0x1e0] ss:$16 sps:$4 sm:$0xff]   ;;  %v1111_v1 = vld [vmem:[%s1476_s1 + $0x1e8] ss:$16 sps:$4 sm:$0xff]  }
  0x17   :  { %446 = vmatpush1.bf16.msra.mxu0 %v1050_v22  ;;  %487 = vmatpush1.bf16.msra.mxu1 %v1051_v23  ;;  %v1114_v2 = vld [vmem:[%s1478_s3 + $0x40] sm:$0xff]   ;;  %v1118_v7 = vld [vmem:[%s1478_s3 + $0x48] sm:$0xff]   ;;  %v1122_v11 = vld [vmem:[%s1478_s3 + $0x50] sm:$0xff]  }
  0x18   :  { %447 = vmatprep.subr.bf16.mxu0 %v1052_v24  ;;  %488 = vmatprep.subr.bf16.mxu1 %v1054_v25  ;;  %v1115_v3 = vld [vmem:[%s1478_s3 + $0xc0] sm:$0xff]   ;;  %v1119_v8 = vld [vmem:[%s1478_s3 + $0xc8] sm:$0xff]   ;;  %v1123_v12 = vld [vmem:[%s1478_s3 + $0xd0] sm:$0xff]  }
  0x19   :  { %v1116_v4 = vld [vmem:[%s1478_s3] sm:$0xff]   ;;  %v1120_v9 = vld [vmem:[%s1478_s3 + $0x8] sm:$0xff]   ;;  %v1124_v13 = vld [vmem:[%s1478_s3 + $0x10] sm:$0xff]  }
  0x1a   :  { %v1117_v6 = vld [vmem:[%s1478_s3 + $0x80] sm:$0xff]   ;;  %v1121_v10 = vld [vmem:[%s1478_s3 + $0x88] sm:$0xff]   ;;  %v1125_v14 = vld [vmem:[%s1478_s3 + $0x90] sm:$0xff]  }
  0x1b   :  { %448 = vmatpush1.bf16.msra.mxu0 %v1056_v26  ;;  %489 = vmatpush1.bf16.msra.mxu1 %v1057_v27  ;;  %v1126_v15 = vld [vmem:[%s1478_s3 + $0x58] sm:$0xff]   ;;  %v1130_v19 = vld [vmem:[%s1478_s3 + $0x60] sm:$0xff]   ;;  %v1134_v23 = vld [vmem:[%s1478_s3 + $0x68] sm:$0xff]  }
  0x1c   :  { %449 = vmatprep.subr.bf16.mxu0 %v1058_v28  ;;  %490 = vmatprep.subr.bf16.mxu1 %v1060_v29  ;;  %v1127_v16 = vld [vmem:[%s1478_s3 + $0xd8] sm:$0xff]   ;;  %v1131_v20 = vld [vmem:[%s1478_s3 + $0xe0] sm:$0xff]   ;;  %v1135_v24 = vld [vmem:[%s1478_s3 + $0xe8] sm:$0xff]  }
  0x1d   :  { %v1128_v17 = vld [vmem:[%s1478_s3 + $0x18] sm:$0xff]   ;;  %v1132_v21 = vld [vmem:[%s1478_s3 + $0x20] sm:$0xff]   ;;  %v1136_v25 = vld [vmem:[%s1478_s3 + $0x28] sm:$0xff]  }
  0x1e   :  { %v1129_v18 = vld [vmem:[%s1478_s3 + $0x98] sm:$0xff]   ;;  %v1133_v22 = vld [vmem:[%s1478_s3 + $0xa0] sm:$0xff]   ;;  %v1137_v26 = vld [vmem:[%s1478_s3 + $0xa8] sm:$0xff]  }
  0x1f   :  { %450 = vmatpush1.bf16.msra.mxu0 %v1062_v30  ;;  %491 = vmatpush1.bf16.msra.mxu1 %v1063_v31  ;;  %v1138_v27 = vld [vmem:[%s1478_s3 + $0x70] sm:$0xff]   ;;  %v1142_v31 = vld [vmem:[%s1478_s3 + $0x78] sm:$0xff]  }
  0x20   :  { %451 = vmatprep.subr.bf16.mxu0 %v1064_v32  ;;  %492 = vmatprep.subr.bf16.mxu1 %v1066_v33  ;;  %v1139_v28 = vld [vmem:[%s1478_s3 + $0xf0] sm:$0xff]   ;;  %v1143_v32 = vld [vmem:[%s1478_s3 + $0xf8] sm:$0xff]  }
  0x21   :  { %v1140_v29 = vld [vmem:[%s1478_s3 + $0x30] sm:$0xff]   ;;  %v1144_v33 = vld [vmem:[%s1478_s3 + $0x38] sm:$0xff]  }
  0x22   :  { %v1141_v30 = vld [vmem:[%s1478_s3 + $0xb0] sm:$0xff]  }
  0x23   :  { %452 = vmatpush1.bf16.msra.mxu0 %v1068_v34  ;;  %493 = vmatpush1.bf16.msra.mxu1 %v1069_v35  ;;  %v1145_v34 = vld [vmem:[%s1478_s3 + $0xb8] sm:$0xff]   ;;  %v88_v35 = vlaneseq }
  0x24   :  { %453 = vmatprep.subr.bf16.mxu0 %v1070_v36  ;;  %494 = vmatprep.subr.bf16.mxu1 %v1072_v37 }
  0x25   :  { %v89_v36 = vshrl.u32 %v88_v35, 7 }
  0x27   :  { %454 = vmatpush1.bf16.msra.mxu0 %v1074_v38  ;;  %495 = vmatpush1.bf16.msra.mxu1 %v1075_v39  ;;  %v90_v37 = vsub.s32 0, %v89_v36  ;;  %v98_v38 = vsub.s32 2, %v89_v36  ;;  %v86_v39 = vld [vmem:[%s1479_s2] sm:$0xf] }
  0x28   :  { %455 = vmatprep.subr.bf16.mxu0 %v1076_v40  ;;  %496 = vmatprep.subr.bf16.mxu1 %v1078_v41  ;;  %v94_v40 = vsub.s32 1, %v89_v36  ;;  %v102_v41 = vsub.s32 3, %v89_v36 }
  0x2b   :  { %456 = vmatpush1.bf16.msra.mxu0 %v1080_v42  ;;  %497 = vmatpush1.bf16.msra.mxu1 %v1081_v43  ;;  %v91_v42 = vrot.slane %v86_v39, %v90_v37  ;;  %v99_v43 = vrot.slane %v86_v39, %v98_v38 }
  0x2c   :  { %457 = vmatprep.subr.bf16.mxu0 %v1082_v44  ;;  %498 = vmatprep.subr.bf16.mxu1 %v1084_v45  ;;  %v95_v44 = vrot.slane %v86_v39, %v94_v40  ;;  %v103_v45 = vrot.slane %v86_v39, %v102_v41 }
  0x2f   :  { %458 = vmatpush1.bf16.msra.mxu0 %v1086_v46  ;;  %499 = vmatpush1.bf16.msra.mxu1 %v1087_v48 }
  0x30   :  { %459 = vmatprep.subr.bf16.mxu0 %v1088_v50  ;;  %500 = vmatprep.subr.bf16.mxu1 %v1090_v51 }
  0x33   :  { %460 = vmatpush1.bf16.msra.mxu0 %v1092_v52  ;;  %501 = vmatpush1.bf16.msra.mxu1 %v1093_v53 }
  0x34   :  { %461 = vmatprep.subr.bf16.mxu0 %v1094_v54  ;;  %502 = vmatprep.subr.bf16.mxu1 %v1096_v55 }
  0x37   :  { %462 = vmatpush1.bf16.msra.mxu0 %v1098_v56  ;;  %503 = vmatpush1.bf16.msra.mxu1 %v1099_v57 }
  0x38   :  { %463 = vmatprep.subr.bf16.mxu0 %v1100_v58  ;;  %504 = vmatprep.subr.bf16.mxu1 %v1102_v59 }
  0x3b   :  { %464 = vmatpush1.bf16.msra.mxu0 %v1104_v60  ;;  %505 = vmatpush1.bf16.msra.mxu1 %v1105_v61 }
  0x3c   :  { %465 = vmatprep.subr.bf16.mxu0 %v1106_v62  ;;  %506 = vmatprep.subr.bf16.mxu1 %v1108_v63 }
  0x3f   :  { %466 = vmatpush1.bf16.msra.mxu0 %v1110_v0  ;;  %507 = vmatpush1.bf16.msra.mxu1 %v1111_v1 }
  0x40   :  { %972 = vmatprep.subr.bf16.mxu0 %v1114_v2  ;;  %994 = vmatprep.subr.bf16.mxu1 %v1115_v3 }
  0x42   :  { %468 = vmatmul.mubr.bf16.vlgmr.msra.gmra.mrb[0].mxu0 %v873_v5  ;;  %509 = vmatmul.mubr.bf16.vlgmr.msra.gmra.mrb[0].mxu1 %v873_v5 }
  0x43   :  { %973 = vmatpush3.bf16.msra.mxu0 %v1116_v4  ;;  %995 = vmatpush3.bf16.msra.mxu1 %v1117_v6  ;;  %v939_v4 = vld [vmem:[%s1480_s4] ss:$0 sm:$0xff] }
  0x44   :  { %974 = vmatprep.subr.bf16.mxu0 %v1118_v7  ;;  %996 = vmatprep.subr.bf16.mxu1 %v1119_v8 }
  0x47   :  { %975 = vmatpush3.bf16.msra.mxu0 %v1120_v9  ;;  %997 = vmatpush3.bf16.msra.mxu1 %v1121_v10 }
  0x48   :  { %976 = vmatprep.subr.bf16.mxu0 %v1122_v11  ;;  %998 = vmatprep.subr.bf16.mxu1 %v1123_v12 }
  0x4b   :  { %977 = vmatpush3.bf16.msra.mxu0 %v1124_v13  ;;  %999 = vmatpush3.bf16.msra.mxu1 %v1125_v14 }
  0x4c   :  { %978 = vmatprep.subr.bf16.mxu0 %v1126_v15  ;;  %1000 = vmatprep.subr.bf16.mxu1 %v1127_v16 }
  0x4f   :  { %979 = vmatpush3.bf16.msra.mxu0 %v1128_v17  ;;  %1001 = vmatpush3.bf16.msra.mxu1 %v1129_v18 }
  0x50   :  { %980 = vmatprep.subr.bf16.mxu0 %v1130_v19  ;;  %1002 = vmatprep.subr.bf16.mxu1 %v1131_v20 }
  0x53   :  { %981 = vmatpush3.bf16.msra.mxu0 %v1132_v21  ;;  %1003 = vmatpush3.bf16.msra.mxu1 %v1133_v22 }
  0x54   :  { %982 = vmatprep.subr.bf16.mxu0 %v1134_v23  ;;  %1004 = vmatprep.subr.bf16.mxu1 %v1135_v24 }
  0x57   :  { %983 = vmatpush3.bf16.msra.mxu0 %v1136_v25  ;;  %1005 = vmatpush3.bf16.msra.mxu1 %v1137_v26 }
  0x58   :  { %984 = vmatprep.subr.bf16.mxu0 %v1138_v27  ;;  %1006 = vmatprep.subr.bf16.mxu1 %v1139_v28 }
  0x5b   :  { %985 = vmatpush3.bf16.msra.mxu0 %v1140_v29  ;;  %1007 = vmatpush3.bf16.msra.mxu1 %v1141_v30 }
  0x5c   :  { %986 = vmatprep.subr.bf16.mxu0 %v1142_v31  ;;  %1008 = vmatprep.subr.bf16.mxu1 %v1143_v32 }
  0x5f   :  { %987 = vmatpush3.bf16.msra.mxu0 %v1144_v33  ;;  %1009 = vmatpush3.bf16.msra.mxu1 %v1145_v34 }
 0x115   :  { %v469_v46 = vpop.f32.mrb[0].mxu0  ;;  %v510_v47 = vpop.f32.mrb[0].mxu1 }
 0x116   :  { %v470_v48 = vadd.f32 %v469_v46, %v91_v42  ;;  %v511_v49 = vadd.f32 %v510_v47, %v99_v43  ;;  %v471_v50 = vpop.f32.mrb[1].mxu0  ;;  %v512_v51 = vpop.f32.mrb[1].mxu1 }
 0x117   :  { %v472_v52 = vadd.f32 %v471_v50, %v95_v44  ;;  %v513_v53 = vadd.f32 %v512_v51, %v103_v45  ;;  %v473_v54 = vpop.f32.mrb[2].mxu0  ;;  %v514_v55 = vpop.f32.mrb[2].mxu1 }
 0x118   :  { %v517_v56 = vmax.f32 %v470_v48, 0.0  ;;  %v519_v57 = vmax.f32 %v511_v49, 0.0  ;;  %v474_v58 = vpop.f32.mrb[3].mxu0  ;;  %v515_v59 = vpop.f32.mrb[3].mxu1 }
 0x119   :  { %v518_v60 = vmax.f32 %v472_v52, 0.0  ;;  %v520_v61 = vmax.f32 %v513_v53, 0.0 }
 0x11a   :  { %v523_v62 = vpack.c.bf16 %v519_v57, %v519_v57  ;;  %v521_v1 = vpack.c.bf16 %v517_v56, %v517_v56 }
 0x11b   :  { %v522_v63 = vpack.c.bf16 %v518_v60, %v518_v60  ;;  %v524_v0 = vpack.c.bf16 %v520_v61, %v520_v61 }
 0x11d   :  { %820 = vmatprep.mubr.bf16.mxu0 %v522_v63  ;;  %860 = vmatprep.mubr.bf16.mxu1 %v524_v0 }
 0x11e   :  { %821 = vmatmul.mubr.bf16.vlgmr.msra.gmra.mrb[4].mxu0 %v521_v1  ;;  %861 = vmatmul.mubr.bf16.vlgmr.msra.gmra.mrb[4].mxu1 %v523_v62 }
 0x1f1   :  { %v988_v2 = vpop.f32.mrb[4].mxu0  ;;  %v1010_v3 = vpop.f32.mrb[4].mxu1 }
 0x1f2   :  { %v989_v5 = vpop.f32.mrb[5].mxu0  ;;  %v1011_v6 = vpop.f32.mrb[5].mxu1 }
 0x1f3   :  { %v990_v7 = vadd.f32 %v989_v5, %v988_v2  ;;  %v1012_v8 = vadd.f32 %v1011_v6, %v1010_v3  ;;  %v991_v9 = vpop.f32.mrb[6].mxu0  ;;  %v1013_v10 = vpop.f32.mrb[6].mxu1 }
 0x1f4   :  { %v992_v11 = vpop.f32.mrb[7].mxu0  ;;  %v1014_v12 = vpop.f32.mrb[7].mxu1 }
 0x1f5   :  { %v823_v13 = vadd.f32 %v990_v7, %v939_v4 }
 0x1f7   :  { %v863_v14 = vadd.f32 %v1012_v8, %v823_v13 }
 0x1f9   :  { %868 = vst [vmem:[%s1481_s5] sm:$0xff] %v863_v14 }

</bundles_post_ra>
